<compile_context>
chip_gen: v7x
topology: tpu7x:2x2x1
jax: 0.10.0
libtpu: 0.0.40
codegen_flags: <defaults>
</compile_context>

<pallas_src>
import functools
import math

import jax
import jax.numpy as jnp
from jax.experimental import pallas as pl
from jax.experimental.pallas import tpu as pltpu


# ----------------------------------------------------------------------------
# Kernel 1: fused multi-head-attention block for one batch element
#   out = LayerNorm(x + Wo @ MHA(x))
# ----------------------------------------------------------------------------
def _mha_block_kernel(x_ref, wqkv_ref, bqkv_ref, wo_ref, bo_ref, mask_ref,
                      g_ref, be_ref, o_ref, *, n_heads, inv_scale):
    x = x_ref[0]                                      # [L, H]  f32
    L, H = x.shape
    hd = H // n_heads

    # Fused Q|K|V projection: single bf16 MXU pass, f32 accumulation.
    qkv = jnp.dot(x.astype(jnp.bfloat16), wqkv_ref[...],
                  preferred_element_type=jnp.float32) + bqkv_ref[...]   # [L, 3H]

    m = mask_ref[0]                                   # [1, L]  (1.0 = keep)
    neg = jnp.float32(-1e10)

    ctx_parts = []
    for h in range(n_heads):                          # static unroll over heads
        q = qkv[:, h * hd:(h + 1) * hd]
        k = qkv[:, H + h * hd:H + (h + 1) * hd]
        v = qkv[:, 2 * H + h * hd:2 * H + (h + 1) * hd]
        # energy = q @ k.T / sqrt(hd)  (contraction spec avoids explicit transpose)
        e = jax.lax.dot_general(
            q.astype(jnp.bfloat16), k.astype(jnp.bfloat16),
            (((1,), (1,)), ((), ())),
            preferred_element_type=jnp.float32) * inv_scale            # [L, L]
        e = jnp.where(m > 0, e, neg)                  # masked_fill(mask==0, -1e10)
        emax = jnp.max(e, axis=-1, keepdims=True)
        p = jnp.exp(e - emax)
        attn = p / jnp.sum(p, axis=-1, keepdims=True)                  # softmax(keys)
        ctx_parts.append(jnp.dot(attn.astype(jnp.bfloat16), v.astype(jnp.bfloat16),
                                 preferred_element_type=jnp.float32))  # [L, hd]
    ctx = jnp.concatenate(ctx_parts, axis=-1)         # [L, H]  (heads re-merged)

    out = jnp.dot(ctx.astype(jnp.bfloat16), wo_ref[...],
                  preferred_element_type=jnp.float32) + bo_ref[...]

    # fused residual + LayerNorm (eps = 1e-5, PyTorch semantics)
    z = x + out
    mean = jnp.mean(z, axis=-1, keepdims=True)
    var = jnp.mean((z - mean) ** 2, axis=-1, keepdims=True)
    o_ref[0] = (z - mean) * jax.lax.rsqrt(var + 1e-5) * g_ref[...] + be_ref[...]


def mha_block(x, mask_f, lp, n_heads):
    """x: [B, L, H] f32, mask_f: [B, 1, L] f32 -> LayerNorm(x + MHA(x)) : [B, L, H]."""
    B, L, H = x.shape
    hd = H // n_heads
    kern = functools.partial(_mha_block_kernel, n_heads=n_heads,
                             inv_scale=1.0 / math.sqrt(hd))
    return pl.pallas_call(
        kern,
        grid=(B,),
        out_shape=jax.ShapeDtypeStruct((B, L, H), jnp.float32),
        in_specs=[
            pl.BlockSpec((1, L, H), lambda b: (b, 0, 0)),        # x (per batch)
            pl.BlockSpec((H, 3 * H), lambda b: (0, 0)),          # Wqkv (resident)
            pl.BlockSpec((1, 3 * H), lambda b: (0, 0)),          # bqkv
            pl.BlockSpec((H, H), lambda b: (0, 0)),              # Wo
            pl.BlockSpec((1, H), lambda b: (0, 0)),              # bo
            pl.BlockSpec((1, 1, L), lambda b: (b, 0, 0)),        # pad mask (per batch)
            pl.BlockSpec((1, H), lambda b: (0, 0)),              # ln gamma
            pl.BlockSpec((1, H), lambda b: (0, 0)),              # ln beta
        ],
        out_specs=pl.BlockSpec((1, L, H), lambda b: (b, 0, 0)),
        compiler_params=pltpu.CompilerParams(
            dimension_semantics=("parallel",)),
    )(x,
      lp["wqkv"].astype(jnp.bfloat16), lp["bqkv"].reshape(1, 3 * H),
      lp["wo"].astype(jnp.bfloat16), lp["bo"].reshape(1, H),
      mask_f,
      lp["ln1_g"].reshape(1, H), lp["ln1_b"].reshape(1, H))


# ----------------------------------------------------------------------------
# Kernel 2: fused positionwise FFN block
#   out = LayerNorm(x + W2 @ relu(W1 @ x + b1) + b2)
# ----------------------------------------------------------------------------
def _ffn_block_kernel(x_ref, w1_ref, b1_ref, w2_ref, b2_ref, g_ref, be_ref, o_ref):
    x = x_ref[...]                                    # [Mt, H] f32
    h = jnp.dot(x.astype(jnp.bfloat16), w1_ref[...],
                preferred_element_type=jnp.float32) + b1_ref[...]
    h = jnp.maximum(h, 0.0)                           # ReLU
    y = jnp.dot(h.astype(jnp.bfloat16), w2_ref[...],
                preferred_element_type=jnp.float32) + b2_ref[...]
    z = x + y
    mean = jnp.mean(z, axis=-1, keepdims=True)
    var = jnp.mean((z - mean) ** 2, axis=-1, keepdims=True)
    o_ref[...] = (z - mean) * jax.lax.rsqrt(var + 1e-5) * g_ref[...] + be_ref[...]


def ffn_block(x, lp):
    """x: [B, L, H] -> LayerNorm(x + FFN(x)), gridded over M = B*L rows."""
    B, L, H = x.shape
    P = lp["w1"].shape[1]
    M = B * L
    # Row tile: big enough to amortise the ~0.35us/step overhead, small enough that
    # x/h tiles + resident bf16 W1/W2 + double-buffering fit v7x's 64 MiB VMEM too.
    mt = M if M <= 256 else 256
    out = pl.pallas_call(
        _ffn_block_kernel,
        grid=(pl.cdiv(M, mt),),
        out_shape=jax.ShapeDtypeStruct((M, H), jnp.float32),
        in_specs=[
            pl.BlockSpec((mt, H), lambda i: (i, 0)),             # x rows
            pl.BlockSpec((H, P), lambda i: (0, 0)),              # W1 (resident)
            pl.BlockSpec((1, P), lambda i: (0, 0)),              # b1
            pl.BlockSpec((P, H), lambda i: (0, 0)),              # W2 (resident)
            pl.BlockSpec((1, H), lambda i: (0, 0)),              # b2
            pl.BlockSpec((1, H), lambda i: (0, 0)),              # ln gamma
            pl.BlockSpec((1, H), lambda i: (0, 0)),              # ln beta
        ],
        out_specs=pl.BlockSpec((mt, H), lambda i: (i, 0)),
        compiler_params=pltpu.CompilerParams(
            dimension_semantics=("parallel",)),
    )(x.reshape(M, H),
      lp["w1"].astype(jnp.bfloat16), lp["b1"].reshape(1, P),
      lp["w2"].astype(jnp.bfloat16), lp["b2"].reshape(1, H),
      lp["ln2_g"].reshape(1, H), lp["ln2_b"].reshape(1, H))
    return out.reshape(B, L, H)


# ----------------------------------------------------------------------------
# Model glue (plain JAX: embedding gathers, mask reshape)
# ----------------------------------------------------------------------------
def encoder_forward(params, src, src_mask, *, n_heads, hid):
    """src: [B, L] int32, src_mask: [B, 1, 1, L] bool -> [B, L, H] f32."""
    B, L = src.shape
    pos = jnp.arange(L)
    # TODO(synk): embedding gather kept in plain JAX (tiny, no clean Pallas win here).
    x = (jnp.take(params["tok_emb"], src, axis=0) * math.sqrt(hid)
         + jnp.take(params["pos_emb"], pos, axis=0)[None, :, :])
    mask_f = src_mask.reshape(B, 1, L).astype(jnp.float32)
    for lp in params["layers"]:
        x = mha_block(x, mask_f, lp, n_heads)   # MHA + add & LN (attn probs discarded)
        x = ffn_block(x, lp)                    # FFN + add & LN
    return x


# ----------------------------------------------------------------------------
# Deterministic parameter init
# ----------------------------------------------------------------------------
def _enc_layer_params(key, hid, pf):
    k = jax.random.split(key, 4)
    return {
        "wqkv": 0.05 * jax.random.normal(k[0], (hid, 3 * hid), jnp.float32),
        "bqkv": jnp.zeros((3 * hid,), jnp.float32),
        "wo": 0.05 * jax.random.normal(k[1], (hid, hid), jnp.float32),
        "bo": jnp.zeros((hid,), jnp.float32),
        "ln1_g": jnp.ones((hid,), jnp.float32),
        "ln1_b": jnp.zeros((hid,), jnp.float32),
        "w1": 0.05 * jax.random.normal(k[2], (hid, pf), jnp.float32),
        "b1": jnp.zeros((pf,), jnp.float32),
        "w2": 0.05 * jax.random.normal(k[3], (pf, hid), jnp.float32),
        "b2": jnp.zeros((hid,), jnp.float32),
        "ln2_g": jnp.ones((hid,), jnp.float32),
        "ln2_b": jnp.zeros((hid,), jnp.float32),
    }


def init_params(key, input_dim, hid, n_layers, pf, max_len):
    keys = jax.random.split(key, 2 + n_layers)
    return {
        "tok_emb": 0.05 * jax.random.normal(keys[0], (input_dim, hid), jnp.float32),
        "pos_emb": 0.05 * jax.random.normal(keys[1], (max_len, hid), jnp.float32),
        "layers": [_enc_layer_params(keys[2 + i], hid, pf) for i in range(n_layers)],
    }


# ----------------------------------------------------------------------------
if __name__ == "__main__":
    B, SRC_LEN = 2, 8
    INPUT_DIM = 20
    HID, N_HEADS, PF_DIM, N_LAYERS, MAX_LEN = 32, 4, 64, 2, 16
    SRC_PAD_IDX = 0

    root = jax.random.PRNGKey(0)
    kp, ks = jax.random.split(root)
    params = init_params(kp, INPUT_DIM, HID, N_LAYERS, PF_DIM, MAX_LEN)

    src = jax.random.randint(ks, (B, SRC_LEN), 1, INPUT_DIM, dtype=jnp.int32)
    src = src.at[0, -2:].set(SRC_PAD_IDX)              # exercise the pad mask
    src_mask = (src != SRC_PAD_IDX)[:, None, None, :]  # [B, 1, 1, L] bool (spec input)

    fwd = jax.jit(functools.partial(encoder_forward, n_heads=N_HEADS, hid=HID))
    out = fwd(params, src, src_mask)
    jax.block_until_ready(out)

    assert out.shape == (B, SRC_LEN, HID)
    assert bool(jnp.all(jnp.isfinite(out)))
    print("KERNEL_OK")
</pallas_src>

<mosaic_0001>
module attributes {stable_mosaic.version = 11 : i64} {
  func.func @_ffn_block_kernel(%arg0: i32, %arg1: memref<16x32xf32, #tpu.memory_space<vmem>>, %arg2: memref<32x64xbf16, #tpu.memory_space<vmem>>, %arg3: memref<1x64xf32, #tpu.memory_space<vmem>>, %arg4: memref<64x32xbf16, #tpu.memory_space<vmem>>, %arg5: memref<1x32xf32, #tpu.memory_space<vmem>>, %arg6: memref<1x32xf32, #tpu.memory_space<vmem>>, %arg7: memref<1x32xf32, #tpu.memory_space<vmem>>, %arg8: memref<16x32xf32, #tpu.memory_space<vmem>>) attributes {dimension_semantics = [#tpu.dimension_semantics<parallel>], iteration_bounds = array<i64: 1>, scalar_prefetch = 0 : i64, scratch_operands = 0 : i64, tpu.core_type = #tpu.core_type<tc>, window_params = [{transform_indices = @transform_0, window_bounds = array<i64: 16, 32>}, {pipeline_mode = #tpu.pipeline_mode<synchronous>, transform_indices = @transform_1, window_bounds = array<i64: 32, 64>}, {pipeline_mode = #tpu.pipeline_mode<synchronous>, transform_indices = @transform_2, window_bounds = array<i64: 1, 64>}, {pipeline_mode = #tpu.pipeline_mode<synchronous>, transform_indices = @transform_3, window_bounds = array<i64: 64, 32>}, {pipeline_mode = #tpu.pipeline_mode<synchronous>, transform_indices = @transform_4, window_bounds = array<i64: 1, 32>}, {pipeline_mode = #tpu.pipeline_mode<synchronous>, transform_indices = @transform_5, window_bounds = array<i64: 1, 32>}, {pipeline_mode = #tpu.pipeline_mode<synchronous>, transform_indices = @transform_6, window_bounds = array<i64: 1, 32>}, {transform_indices = @transform_7, window_bounds = array<i64: 16, 32>}]} {
    %c0 = arith.constant 0 : index
    %c0_0 = arith.constant 0 : index
    %0 = vector.load %arg1[%c0, %c0_0] : memref<16x32xf32, #tpu.memory_space<vmem>>, vector<16x32xf32>
    %1 = arith.truncf %0 : vector<16x32xf32> to vector<16x32xbf16>
    %c0_1 = arith.constant 0 : index
    %c0_2 = arith.constant 0 : index
    %2 = vector.load %arg2[%c0_1, %c0_2] : memref<32x64xbf16, #tpu.memory_space<vmem>>, vector<32x64xbf16>
    %cst = arith.constant dense<0.000000e+00> : vector<16x64xf32>
    %3 = tpu.matmul %1, %2, %cst {dimension_numbers = #tpu.dot_dimension_numbers<[1], [0], [0], [1], [0, 0, 1, 1], [], []>} : vector<16x32xbf16>, vector<32x64xbf16>, vector<16x64xf32> -> vector<16x64xf32>
    %c0_3 = arith.constant 0 : index
    %c0_4 = arith.constant 0 : index
    %4 = vector.load %arg3[%c0_3, %c0_4] : memref<1x64xf32, #tpu.memory_space<vmem>>, vector<1x64xf32>
    %5 = vector.broadcast %4 : vector<1x64xf32> to vector<16x64xf32>
    %6 = arith.addf %3, %5 : vector<16x64xf32>
    %cst_5 = arith.constant 0.000000e+00 : f32
    %7 = vector.broadcast %cst_5 : f32 to vector<16x64xf32>
    %8 = arith.maximumf %6, %7 : vector<16x64xf32>
    %9 = arith.truncf %8 : vector<16x64xf32> to vector<16x64xbf16>
    %c0_6 = arith.constant 0 : index
    %c0_7 = arith.constant 0 : index
    %10 = vector.load %arg4[%c0_6, %c0_7] : memref<64x32xbf16, #tpu.memory_space<vmem>>, vector<64x32xbf16>
    %cst_8 = arith.constant dense<0.000000e+00> : vector<16x32xf32>
    %11 = tpu.matmul %9, %10, %cst_8 {dimension_numbers = #tpu.dot_dimension_numbers<[1], [0], [0], [1], [0, 0, 1, 1], [], []>} : vector<16x64xbf16>, vector<64x32xbf16>, vector<16x32xf32> -> vector<16x32xf32>
    %c0_9 = arith.constant 0 : index
    %c0_10 = arith.constant 0 : index
    %12 = vector.load %arg5[%c0_9, %c0_10] : memref<1x32xf32, #tpu.memory_space<vmem>>, vector<1x32xf32>
    %13 = vector.broadcast %12 : vector<1x32xf32> to vector<16x32xf32>
    %14 = arith.addf %11, %13 : vector<16x32xf32>
    %15 = arith.addf %0, %14 : vector<16x32xf32>
    %cst_11 = arith.constant dense<0.000000e+00> : vector<16xf32>
    %16 = vector.multi_reduction <add>, %15, %cst_11 [1] : vector<16x32xf32> to vector<16xf32>
    %17 = vector.shape_cast %16 : vector<16xf32> to vector<16x1xf32>
    %cst_12 = arith.constant 3.200000e+01 : f32
    %18 = vector.broadcast %cst_12 : f32 to vector<16x1xf32>
    %19 = arith.divf %17, %18 : vector<16x1xf32>
    %20 = vector.broadcast %19 : vector<16x1xf32> to vector<16x32xf32>
    %21 = arith.subf %15, %20 : vector<16x32xf32>
    %22 = arith.mulf %21, %21 : vector<16x32xf32>
    %cst_13 = arith.constant dense<0.000000e+00> : vector<16xf32>
    %23 = vector.multi_reduction <add>, %22, %cst_13 [1] : vector<16x32xf32> to vector<16xf32>
    %24 = vector.shape_cast %23 : vector<16xf32> to vector<16x1xf32>
    %cst_14 = arith.constant 3.200000e+01 : f32
    %25 = vector.broadcast %cst_14 : f32 to vector<16x1xf32>
    %26 = arith.divf %24, %25 : vector<16x1xf32>
    %27 = vector.broadcast %19 : vector<16x1xf32> to vector<16x32xf32>
    %28 = arith.subf %15, %27 : vector<16x32xf32>
    %cst_15 = arith.constant 9.99999974E-6 : f32
    %29 = vector.broadcast %cst_15 : f32 to vector<16x1xf32>
    %30 = arith.addf %26, %29 : vector<16x1xf32>
    %31 = math.rsqrt %30 : vector<16x1xf32>
    %32 = vector.broadcast %31 : vector<16x1xf32> to vector<16x32xf32>
    %33 = arith.mulf %28, %32 : vector<16x32xf32>
    %c0_16 = arith.constant 0 : index
    %c0_17 = arith.constant 0 : index
    %34 = vector.load %arg6[%c0_16, %c0_17] : memref<1x32xf32, #tpu.memory_space<vmem>>, vector<1x32xf32>
    %35 = vector.broadcast %34 : vector<1x32xf32> to vector<16x32xf32>
    %36 = arith.mulf %33, %35 : vector<16x32xf32>
    %c0_18 = arith.constant 0 : index
    %c0_19 = arith.constant 0 : index
    %37 = vector.load %arg7[%c0_18, %c0_19] : memref<1x32xf32, #tpu.memory_space<vmem>>, vector<1x32xf32>
    %38 = vector.broadcast %37 : vector<1x32xf32> to vector<16x32xf32>
    %39 = arith.addf %36, %38 : vector<16x32xf32>
    %c0_20 = arith.constant 0 : index
    %c0_21 = arith.constant 0 : index
    %40 = vector.load %arg8[%c0_20, %c0_21] : memref<16x32xf32, #tpu.memory_space<vmem>>, vector<16x32xf32>
    tpu.vector_store %arg8[%c0_20, %c0_21], %39 {strides = array<i32>} : memref<16x32xf32, #tpu.memory_space<vmem>>, vector<16x32xf32>,
    return
  }
  func.func @transform_0(%arg0: i32) -> (i32, i32) {
    %c0_i32 = arith.constant 0 : i32
    %c0_i32_0 = arith.constant 0 : i32
    return %arg0, %c0_i32 : i32, i32
  }
  func.func @transform_1(%arg0: i32) -> (i32, i32) {
    %c0_i32 = arith.constant 0 : i32
    %c0_i32_0 = arith.constant 0 : i32
    %c0_i32_1 = arith.constant 0 : i32
    return %c0_i32, %c0_i32_0 : i32, i32
  }
  func.func @transform_2(%arg0: i32) -> (i32, i32) {
    %c0_i32 = arith.constant 0 : i32
    %c0_i32_0 = arith.constant 0 : i32
    %c0_i32_1 = arith.constant 0 : i32
    return %c0_i32, %c0_i32_0 : i32, i32
  }
  func.func @transform_3(%arg0: i32) -> (i32, i32) {
    %c0_i32 = arith.constant 0 : i32
    %c0_i32_0 = arith.constant 0 : i32
    %c0_i32_1 = arith.constant 0 : i32
    return %c0_i32, %c0_i32_0 : i32, i32
  }
  func.func @transform_4(%arg0: i32) -> (i32, i32) {
    %c0_i32 = arith.constant 0 : i32
    %c0_i32_0 = arith.constant 0 : i32
    %c0_i32_1 = arith.constant 0 : i32
    return %c0_i32, %c0_i32_0 : i32, i32
  }
  func.func @transform_5(%arg0: i32) -> (i32, i32) {
    %c0_i32 = arith.constant 0 : i32
    %c0_i32_0 = arith.constant 0 : i32
    %c0_i32_1 = arith.constant 0 : i32
    return %c0_i32, %c0_i32_0 : i32, i32
  }
  func.func @transform_6(%arg0: i32) -> (i32, i32) {
    %c0_i32 = arith.constant 0 : i32
    %c0_i32_0 = arith.constant 0 : i32
    %c0_i32_1 = arith.constant 0 : i32
    return %c0_i32, %c0_i32_0 : i32, i32
  }
  func.func @transform_7(%arg0: i32) -> (i32, i32) {
    %c0_i32 = arith.constant 0 : i32
    %c0_i32_0 = arith.constant 0 : i32
    return %arg0, %c0_i32 : i32, i32
  }
}

module attributes {stable_mosaic.version = 11 : i64} {
  func.func @_mha_block_kernel(%arg0: i32, %arg1: memref<1x8x32xf32, #tpu.memory_space<vmem>>, %arg2: memref<32x96xbf16, #tpu.memory_space<vmem>>, %arg3: memref<1x96xf32, #tpu.memory_space<vmem>>, %arg4: memref<32x32xbf16, #tpu.memory_space<vmem>>, %arg5: memref<1x32xf32, #tpu.memory_space<vmem>>, %arg6: memref<1x1x8xf32, #tpu.memory_space<vmem>>, %arg7: memref<1x32xf32, #tpu.memory_space<vmem>>, %arg8: memref<1x32xf32, #tpu.memory_space<vmem>>, %arg9: memref<1x8x32xf32, #tpu.memory_space<vmem>>) attributes {dimension_semantics = [#tpu.dimension_semantics<parallel>], iteration_bounds = array<i64: 2>, scalar_prefetch = 0 : i64, scratch_operands = 0 : i64, tpu.core_type = #tpu.core_type<tc>, window_params = [{transform_indices = @transform_0, window_bounds = array<i64: 1, 8, 32>}, {pipeline_mode = #tpu.pipeline_mode<synchronous>, transform_indices = @transform_1, window_bounds = array<i64: 32, 96>}, {pipeline_mode = #tpu.pipeline_mode<synchronous>, transform_indices = @transform_2, window_bounds = array<i64: 1, 96>}, {pipeline_mode = #tpu.pipeline_mode<synchronous>, transform_indices = @transform_3, window_bounds = array<i64: 32, 32>}, {pipeline_mode = #tpu.pipeline_mode<synchronous>, transform_indices = @transform_4, window_bounds = array<i64: 1, 32>}, {transform_indices = @transform_5, window_bounds = array<i64: 1, 1, 8>}, {pipeline_mode = #tpu.pipeline_mode<synchronous>, transform_indices = @transform_6, window_bounds = array<i64: 1, 32>}, {pipeline_mode = #tpu.pipeline_mode<synchronous>, transform_indices = @transform_7, window_bounds = array<i64: 1, 32>}, {transform_indices = @transform_8, window_bounds = array<i64: 1, 8, 32>}]} {
    %c0 = arith.constant 0 : index
    %c0_0 = arith.constant 0 : index
    %c0_1 = arith.constant 0 : index
    %0 = vector.load %arg1[%c0, %c0_0, %c0_1] : memref<1x8x32xf32, #tpu.memory_space<vmem>>, vector<1x8x32xf32>
    %1 = vector.shape_cast %0 : vector<1x8x32xf32> to vector<8x32xf32>
    %2 = arith.truncf %1 : vector<8x32xf32> to vector<8x32xbf16>
    %c0_2 = arith.constant 0 : index
    %c0_3 = arith.constant 0 : index
    %3 = vector.load %arg2[%c0_2, %c0_3] : memref<32x96xbf16, #tpu.memory_space<vmem>>, vector<32x96xbf16>
    %cst = arith.constant dense<0.000000e+00> : vector<8x96xf32>
    %4 = tpu.matmul %2, %3, %cst {dimension_numbers = #tpu.dot_dimension_numbers<[1], [0], [0], [1], [0, 0, 1, 1], [], []>} : vector<8x32xbf16>, vector<32x96xbf16>, vector<8x96xf32> -> vector<8x96xf32>
    %c0_4 = arith.constant 0 : index
    %c0_5 = arith.constant 0 : index
    %5 = vector.load %arg3[%c0_4, %c0_5] : memref<1x96xf32, #tpu.memory_space<vmem>>, vector<1x96xf32>
    %6 = vector.broadcast %5 : vector<1x96xf32> to vector<8x96xf32>
    %7 = arith.addf %4, %6 : vector<8x96xf32>
    %c0_6 = arith.constant 0 : index
    %c0_7 = arith.constant 0 : index
    %c0_8 = arith.constant 0 : index
    %8 = vector.load %arg6[%c0_6, %c0_7, %c0_8] : memref<1x1x8xf32, #tpu.memory_space<vmem>>, vector<1x1x8xf32>
    %9 = vector.shape_cast %8 : vector<1x1x8xf32> to vector<1x8xf32>
    %10 = vector.extract_strided_slice %7 {offsets = [0, 0], sizes = [8, 8], strides = [1, 1]} : vector<8x96xf32> to vector<8x8xf32>
    %11 = vector.extract_strided_slice %7 {offsets = [0, 32], sizes = [8, 8], strides = [1, 1]} : vector<8x96xf32> to vector<8x8xf32>
    %12 = vector.extract_strided_slice %7 {offsets = [0, 64], sizes = [8, 8], strides = [1, 1]} : vector<8x96xf32> to vector<8x8xf32>
    %13 = arith.truncf %10 : vector<8x8xf32> to vector<8x8xbf16>
    %14 = arith.truncf %11 : vector<8x8xf32> to vector<8x8xbf16>
    %cst_9 = arith.constant dense<0.000000e+00> : vector<8x8xf32>
    %15 = tpu.matmul %13, %14, %cst_9 {dimension_numbers = #tpu.dot_dimension_numbers<[1], [1], [0], [0], [0, 0, 1, 0], [], []>} : vector<8x8xbf16>, vector<8x8xbf16>, vector<8x8xf32> -> vector<8x8xf32>
    %cst_10 = arith.constant 0.353553385 : f32
    %16 = vector.broadcast %cst_10 : f32 to vector<8x8xf32>
    %17 = arith.mulf %15, %16 : vector<8x8xf32>
    %cst_11 = arith.constant 0.000000e+00 : f32
    %18 = vector.broadcast %cst_11 : f32 to vector<1x8xf32>
    %19 = arith.cmpf ogt, %9, %18 : vector<1x8xf32>
    %cst_12 = arith.constant -1.000000e+10 : f32
    %20 = vector.shape_cast %19 : vector<1x8xi1> to vector<1x8xi1>
    %21 = vector.broadcast %20 : vector<1x8xi1> to vector<8x8xi1>
    %22 = vector.broadcast %cst_12 : f32 to vector<8x8xf32>
    %23 = arith.select %21, %17, %22 : vector<8x8xi1>, vector<8x8xf32>
    %cst_13 = arith.constant dense<0xFF800000> : vector<8xf32>
    %24 = vector.multi_reduction <maximumf>, %23, %cst_13 [1] : vector<8x8xf32> to vector<8xf32>
    %25 = vector.shape_cast %24 : vector<8xf32> to vector<8x1xf32>
    %26 = vector.broadcast %25 : vector<8x1xf32> to vector<8x8xf32>
    %27 = arith.subf %23, %26 : vector<8x8xf32>
    %28 = math.exp %27 : vector<8x8xf32>
    %cst_14 = arith.constant dense<0.000000e+00> : vector<8xf32>
    %29 = vector.multi_reduction <add>, %28, %cst_14 [1] : vector<8x8xf32> to vector<8xf32>
    %30 = vector.shape_cast %29 : vector<8xf32> to vector<8x1xf32>
    %31 = vector.broadcast %30 : vector<8x1xf32> to vector<8x8xf32>
    %32 = arith.divf %28, %31 : vector<8x8xf32>
    %33 = arith.truncf %32 : vector<8x8xf32> to vector<8x8xbf16>
    %34 = arith.truncf %12 : vector<8x8xf32> to vector<8x8xbf16>
    %cst_15 = arith.constant dense<0.000000e+00> : vector<8x8xf32>
    %35 = tpu.matmul %33, %34, %cst_15 {dimension_numbers = #tpu.dot_dimension_numbers<[1], [0], [0], [1], [0, 0, 1, 1], [], []>} : vector<8x8xbf16>, vector<8x8xbf16>, vector<8x8xf32> -> vector<8x8xf32>
    %36 = vector.extract_strided_slice %7 {offsets = [0, 8], sizes = [8, 8], strides = [1, 1]} : vector<8x96xf32> to vector<8x8xf32>
    %37 = vector.extract_strided_slice %7 {offsets = [0, 40], sizes = [8, 8], strides = [1, 1]} : vector<8x96xf32> to vector<8x8xf32>
    %38 = vector.extract_strided_slice %7 {offsets = [0, 72], sizes = [8, 8], strides = [1, 1]} : vector<8x96xf32> to vector<8x8xf32>
    %39 = arith.truncf %36 : vector<8x8xf32> to vector<8x8xbf16>
    %40 = arith.truncf %37 : vector<8x8xf32> to vector<8x8xbf16>
    %cst_16 = arith.constant dense<0.000000e+00> : vector<8x8xf32>
    %41 = tpu.matmul %39, %40, %cst_16 {dimension_numbers = #tpu.dot_dimension_numbers<[1], [1], [0], [0], [0, 0, 1, 0], [], []>} : vector<8x8xbf16>, vector<8x8xbf16>, vector<8x8xf32> -> vector<8x8xf32>
    %cst_17 = arith.constant 0.353553385 : f32
    %42 = vector.broadcast %cst_17 : f32 to vector<8x8xf32>
    %43 = arith.mulf %41, %42 : vector<8x8xf32>
    %cst_18 = arith.constant 0.000000e+00 : f32
    %44 = vector.broadcast %cst_18 : f32 to vector<1x8xf32>
    %45 = arith.cmpf ogt, %9, %44 : vector<1x8xf32>
    %cst_19 = arith.constant -1.000000e+10 : f32
    %46 = vector.shape_cast %45 : vector<1x8xi1> to vector<1x8xi1>
    %47 = vector.broadcast %46 : vector<1x8xi1> to vector<8x8xi1>
    %48 = vector.broadcast %cst_19 : f32 to vector<8x8xf32>
    %49 = arith.select %47, %43, %48 : vector<8x8xi1>, vector<8x8xf32>
    %cst_20 = arith.constant dense<0xFF800000> : vector<8xf32>
    %50 = vector.multi_reduction <maximumf>, %49, %cst_20 [1] : vector<8x8xf32> to vector<8xf32>
    %51 = vector.shape_cast %50 : vector<8xf32> to vector<8x1xf32>
    %52 = vector.broadcast %51 : vector<8x1xf32> to vector<8x8xf32>
    %53 = arith.subf %49, %52 : vector<8x8xf32>
    %54 = math.exp %53 : vector<8x8xf32>
    %cst_21 = arith.constant dense<0.000000e+00> : vector<8xf32>
    %55 = vector.multi_reduction <add>, %54, %cst_21 [1] : vector<8x8xf32> to vector<8xf32>
    %56 = vector.shape_cast %55 : vector<8xf32> to vector<8x1xf32>
    %57 = vector.broadcast %56 : vector<8x1xf32> to vector<8x8xf32>
    %58 = arith.divf %54, %57 : vector<8x8xf32>
    %59 = arith.truncf %58 : vector<8x8xf32> to vector<8x8xbf16>
    %60 = arith.truncf %38 : vector<8x8xf32> to vector<8x8xbf16>
    %cst_22 = arith.constant dense<0.000000e+00> : vector<8x8xf32>
    %61 = tpu.matmul %59, %60, %cst_22 {dimension_numbers = #tpu.dot_dimension_numbers<[1], [0], [0], [1], [0, 0, 1, 1], [], []>} : vector<8x8xbf16>, vector<8x8xbf16>, vector<8x8xf32> -> vector<8x8xf32>
    %62 = vector.extract_strided_slice %7 {offsets = [0, 16], sizes = [8, 8], strides = [1, 1]} : vector<8x96xf32> to vector<8x8xf32>
    %63 = vector.extract_strided_slice %7 {offsets = [0, 48], sizes = [8, 8], strides = [1, 1]} : vector<8x96xf32> to vector<8x8xf32>
    %64 = vector.extract_strided_slice %7 {offsets = [0, 80], sizes = [8, 8], strides = [1, 1]} : vector<8x96xf32> to vector<8x8xf32>
    %65 = arith.truncf %62 : vector<8x8xf32> to vector<8x8xbf16>
    %66 = arith.truncf %63 : vector<8x8xf32> to vector<8x8xbf16>
    %cst_23 = arith.constant dense<0.000000e+00> : vector<8x8xf32>
    %67 = tpu.matmul %65, %66, %cst_23 {dimension_numbers = #tpu.dot_dimension_numbers<[1], [1], [0], [0], [0, 0, 1, 0], [], []>} : vector<8x8xbf16>, vector<8x8xbf16>, vector<8x8xf32> -> vector<8x8xf32>
    %cst_24 = arith.constant 0.353553385 : f32
    %68 = vector.broadcast %cst_24 : f32 to vector<8x8xf32>
    %69 = arith.mulf %67, %68 : vector<8x8xf32>
    %cst_25 = arith.constant 0.000000e+00 : f32
    %70 = vector.broadcast %cst_25 : f32 to vector<1x8xf32>
    %71 = arith.cmpf ogt, %9, %70 : vector<1x8xf32>
    %cst_26 = arith.constant -1.000000e+10 : f32
    %72 = vector.shape_cast %71 : vector<1x8xi1> to vector<1x8xi1>
    %73 = vector.broadcast %72 : vector<1x8xi1> to vector<8x8xi1>
    %74 = vector.broadcast %cst_26 : f32 to vector<8x8xf32>
    %75 = arith.select %73, %69, %74 : vector<8x8xi1>, vector<8x8xf32>
    %cst_27 = arith.constant dense<0xFF800000> : vector<8xf32>
    %76 = vector.multi_reduction <maximumf>, %75, %cst_27 [1] : vector<8x8xf32> to vector<8xf32>
    %77 = vector.shape_cast %76 : vector<8xf32> to vector<8x1xf32>
    %78 = vector.broadcast %77 : vector<8x1xf32> to vector<8x8xf32>
    %79 = arith.subf %75, %78 : vector<8x8xf32>
    %80 = math.exp %79 : vector<8x8xf32>
    %cst_28 = arith.constant dense<0.000000e+00> : vector<8xf32>
    %81 = vector.multi_reduction <add>, %80, %cst_28 [1] : vector<8x8xf32> to vector<8xf32>
    %82 = vector.shape_cast %81 : vector<8xf32> to vector<8x1xf32>
    %83 = vector.broadcast %82 : vector<8x1xf32> to vector<8x8xf32>
    %84 = arith.divf %80, %83 : vector<8x8xf32>
    %85 = arith.truncf %84 : vector<8x8xf32> to vector<8x8xbf16>
    %86 = arith.truncf %64 : vector<8x8xf32> to vector<8x8xbf16>
    %cst_29 = arith.constant dense<0.000000e+00> : vector<8x8xf32>
    %87 = tpu.matmul %85, %86, %cst_29 {dimension_numbers = #tpu.dot_dimension_numbers<[1], [0], [0], [1], [0, 0, 1, 1], [], []>} : vector<8x8xbf16>, vector<8x8xbf16>, vector<8x8xf32> -> vector<8x8xf32>
    %88 = vector.extract_strided_slice %7 {offsets = [0, 24], sizes = [8, 8], strides = [1, 1]} : vector<8x96xf32> to vector<8x8xf32>
    %89 = vector.extract_strided_slice %7 {offsets = [0, 56], sizes = [8, 8], strides = [1, 1]} : vector<8x96xf32> to vector<8x8xf32>
    %90 = vector.extract_strided_slice %7 {offsets = [0, 88], sizes = [8, 8], strides = [1, 1]} : vector<8x96xf32> to vector<8x8xf32>
    %91 = arith.truncf %88 : vector<8x8xf32> to vector<8x8xbf16>
    %92 = arith.truncf %89 : vector<8x8xf32> to vector<8x8xbf16>
    %cst_30 = arith.constant dense<0.000000e+00> : vector<8x8xf32>
    %93 = tpu.matmul %91, %92, %cst_30 {dimension_numbers = #tpu.dot_dimension_numbers<[1], [1], [0], [0], [0, 0, 1, 0], [], []>} : vector<8x8xbf16>, vector<8x8xbf16>, vector<8x8xf32> -> vector<8x8xf32>
    %cst_31 = arith.constant 0.353553385 : f32
    %94 = vector.broadcast %cst_31 : f32 to vector<8x8xf32>
    %95 = arith.mulf %93, %94 : vector<8x8xf32>
    %cst_32 = arith.constant 0.000000e+00 : f32
    %96 = vector.broadcast %cst_32 : f32 to vector<1x8xf32>
    %97 = arith.cmpf ogt, %9, %96 : vector<1x8xf32>
    %cst_33 = arith.constant -1.000000e+10 : f32
    %98 = vector.shape_cast %97 : vector<1x8xi1> to vector<1x8xi1>
    %99 = vector.broadcast %98 : vector<1x8xi1> to vector<8x8xi1>
    %100 = vector.broadcast %cst_33 : f32 to vector<8x8xf32>
    %101 = arith.select %99, %95, %100 : vector<8x8xi1>, vector<8x8xf32>
    %cst_34 = arith.constant dense<0xFF800000> : vector<8xf32>
    %102 = vector.multi_reduction <maximumf>, %101, %cst_34 [1] : vector<8x8xf32> to vector<8xf32>
    %103 = vector.shape_cast %102 : vector<8xf32> to vector<8x1xf32>
    %104 = vector.broadcast %103 : vector<8x1xf32> to vector<8x8xf32>
    %105 = arith.subf %101, %104 : vector<8x8xf32>
    %106 = math.exp %105 : vector<8x8xf32>
    %cst_35 = arith.constant dense<0.000000e+00> : vector<8xf32>
    %107 = vector.multi_reduction <add>, %106, %cst_35 [1] : vector<8x8xf32> to vector<8xf32>
    %108 = vector.shape_cast %107 : vector<8xf32> to vector<8x1xf32>
    %109 = vector.broadcast %108 : vector<8x1xf32> to vector<8x8xf32>
    %110 = arith.divf %106, %109 : vector<8x8xf32>
    %111 = arith.truncf %110 : vector<8x8xf32> to vector<8x8xbf16>
    %112 = arith.truncf %90 : vector<8x8xf32> to vector<8x8xbf16>
    %cst_36 = arith.constant dense<0.000000e+00> : vector<8x8xf32>
    %113 = tpu.matmul %111, %112, %cst_36 {dimension_numbers = #tpu.dot_dimension_numbers<[1], [0], [0], [1], [0, 0, 1, 1], [], []>} : vector<8x8xbf16>, vector<8x8xbf16>, vector<8x8xf32> -> vector<8x8xf32>
    %114 = tpu.concatenate %35, %61, %87, %113 in 1 : vector<8x8xf32>, vector<8x8xf32>, vector<8x8xf32>, vector<8x8xf32> -> vector<8x32xf32>
    %115 = arith.truncf %114 : vector<8x32xf32> to vector<8x32xbf16>
    %c0_37 = arith.constant 0 : index
    %c0_38 = arith.constant 0 : index
    %116 = vector.load %arg4[%c0_37, %c0_38] : memref<32x32xbf16, #tpu.memory_space<vmem>>, vector<32x32xbf16>
    %cst_39 = arith.constant dense<0.000000e+00> : vector<8x32xf32>
    %117 = tpu.matmul %115, %116, %cst_39 {dimension_numbers = #tpu.dot_dimension_numbers<[1], [0], [0], [1], [0, 0, 1, 1], [], []>} : vector<8x32xbf16>, vector<32x32xbf16>, vector<8x32xf32> -> vector<8x32xf32>
    %c0_40 = arith.constant 0 : index
    %c0_41 = arith.constant 0 : index
    %118 = vector.load %arg5[%c0_40, %c0_41] : memref<1x32xf32, #tpu.memory_space<vmem>>, vector<1x32xf32>
    %119 = vector.broadcast %118 : vector<1x32xf32> to vector<8x32xf32>
    %120 = arith.addf %117, %119 : vector<8x32xf32>
    %121 = arith.addf %1, %120 : vector<8x32xf32>
    %cst_42 = arith.constant dense<0.000000e+00> : vector<8xf32>
    %122 = vector.multi_reduction <add>, %121, %cst_42 [1] : vector<8x32xf32> to vector<8xf32>
    %123 = vector.shape_cast %122 : vector<8xf32> to vector<8x1xf32>
    %cst_43 = arith.constant 3.200000e+01 : f32
    %124 = vector.broadcast %cst_43 : f32 to vector<8x1xf32>
    %125 = arith.divf %123, %124 : vector<8x1xf32>
    %126 = vector.broadcast %125 : vector<8x1xf32> to vector<8x32xf32>
    %127 = arith.subf %121, %126 : vector<8x32xf32>
    %128 = arith.mulf %127, %127 : vector<8x32xf32>
    %cst_44 = arith.constant dense<0.000000e+00> : vector<8xf32>
    %129 = vector.multi_reduction <add>, %128, %cst_44 [1] : vector<8x32xf32> to vector<8xf32>
    %130 = vector.shape_cast %129 : vector<8xf32> to vector<8x1xf32>
    %cst_45 = arith.constant 3.200000e+01 : f32
    %131 = vector.broadcast %cst_45 : f32 to vector<8x1xf32>
    %132 = arith.divf %130, %131 : vector<8x1xf32>
    %133 = vector.broadcast %125 : vector<8x1xf32> to vector<8x32xf32>
    %134 = arith.subf %121, %133 : vector<8x32xf32>
    %cst_46 = arith.constant 9.99999974E-6 : f32
    %135 = vector.broadcast %cst_46 : f32 to vector<8x1xf32>
    %136 = arith.addf %132, %135 : vector<8x1xf32>
    %137 = math.rsqrt %136 : vector<8x1xf32>
    %138 = vector.broadcast %137 : vector<8x1xf32> to vector<8x32xf32>
    %139 = arith.mulf %134, %138 : vector<8x32xf32>
    %c0_47 = arith.constant 0 : index
    %c0_48 = arith.constant 0 : index
    %140 = vector.load %arg7[%c0_47, %c0_48] : memref<1x32xf32, #tpu.memory_space<vmem>>, vector<1x32xf32>
    %141 = vector.broadcast %140 : vector<1x32xf32> to vector<8x32xf32>
    %142 = arith.mulf %139, %141 : vector<8x32xf32>
    %c0_49 = arith.constant 0 : index
    %c0_50 = arith.constant 0 : index
    %143 = vector.load %arg8[%c0_49, %c0_50] : memref<1x32xf32, #tpu.memory_space<vmem>>, vector<1x32xf32>
    %144 = vector.broadcast %143 : vector<1x32xf32> to vector<8x32xf32>
    %145 = arith.addf %142, %144 : vector<8x32xf32>
    %c0_51 = arith.constant 0 : index
    %c0_52 = arith.constant 0 : index
    %c0_53 = arith.constant 0 : index
    %146 = vector.load %arg9[%c0_51, %c0_52, %c0_53] : memref<1x8x32xf32, #tpu.memory_space<vmem>>, vector<1x8x32xf32>
    %147 = vector.shape_cast %146 : vector<1x8x32xf32> to vector<8x32xf32>
    %148 = vector.shape_cast %145 : vector<8x32xf32> to vector<1x8x32xf32>
    tpu.vector_store %arg9[%c0_51, %c0_52, %c0_53], %148 {strides = array<i32>} : memref<1x8x32xf32, #tpu.memory_space<vmem>>, vector<1x8x32xf32>,
    return
  }
  func.func @transform_0(%arg0: i32) -> (i32, i32, i32) {
    %c0_i32 = arith.constant 0 : i32
    %c0_i32_0 = arith.constant 0 : i32
    %c0_i32_1 = arith.constant 0 : i32
    return %arg0, %c0_i32, %c0_i32_0 : i32, i32, i32
  }
  func.func @transform_1(%arg0: i32) -> (i32, i32) {
    %c0_i32 = arith.constant 0 : i32
    %c0_i32_0 = arith.constant 0 : i32
    %c0_i32_1 = arith.constant 0 : i32
    return %c0_i32, %c0_i32_0 : i32, i32
  }
  func.func @transform_2(%arg0: i32) -> (i32, i32) {
    %c0_i32 = arith.constant 0 : i32
    %c0_i32_0 = arith.constant 0 : i32
    %c0_i32_1 = arith.constant 0 : i32
    return %c0_i32, %c0_i32_0 : i32, i32
  }
  func.func @transform_3(%arg0: i32) -> (i32, i32) {
    %c0_i32 = arith.constant 0 : i32
    %c0_i32_0 = arith.constant 0 : i32
    %c0_i32_1 = arith.constant 0 : i32
    return %c0_i32, %c0_i32_0 : i32, i32
  }
  func.func @transform_4(%arg0: i32) -> (i32, i32) {
    %c0_i32 = arith.constant 0 : i32
    %c0_i32_0 = arith.constant 0 : i32
    %c0_i32_1 = arith.constant 0 : i32
    return %c0_i32, %c0_i32_0 : i32, i32
  }
  func.func @transform_5(%arg0: i32) -> (i32, i32, i32) {
    %c0_i32 = arith.constant 0 : i32
    %c0_i32_0 = arith.constant 0 : i32
    %c0_i32_1 = arith.constant 0 : i32
    return %arg0, %c0_i32, %c0_i32_0 : i32, i32, i32
  }
  func.func @transform_6(%arg0: i32) -> (i32, i32) {
    %c0_i32 = arith.constant 0 : i32
    %c0_i32_0 = arith.constant 0 : i32
    %c0_i32_1 = arith.constant 0 : i32
    return %c0_i32, %c0_i32_0 : i32, i32
  }
  func.func @transform_7(%arg0: i32) -> (i32, i32) {
    %c0_i32 = arith.constant 0 : i32
    %c0_i32_0 = arith.constant 0 : i32
    %c0_i32_1 = arith.constant 0 : i32
    return %c0_i32, %c0_i32_0 : i32, i32
  }
  func.func @transform_8(%arg0: i32) -> (i32, i32, i32) {
    %c0_i32 = arith.constant 0 : i32
    %c0_i32_0 = arith.constant 0 : i32
    %c0_i32_1 = arith.constant 0 : i32
    return %arg0, %c0_i32, %c0_i32_0 : i32, i32, i32
  }
}

module attributes {stable_mosaic.version = 11 : i64} {
  func.func @_ffn_block_kernel(%arg0: i32, %arg1: memref<16x32xf32, #tpu.memory_space<vmem>>, %arg2: memref<32x64xbf16, #tpu.memory_space<vmem>>, %arg3: memref<1x64xf32, #tpu.memory_space<vmem>>, %arg4: memref<64x32xbf16, #tpu.memory_space<vmem>>, %arg5: memref<1x32xf32, #tpu.memory_space<vmem>>, %arg6: memref<1x32xf32, #tpu.memory_space<vmem>>, %arg7: memref<1x32xf32, #tpu.memory_space<vmem>>, %arg8: memref<16x32xf32, #tpu.memory_space<vmem>>) attributes {dimension_semantics = [#tpu.dimension_semantics<parallel>], iteration_bounds = array<i64: 1>, scalar_prefetch = 0 : i64, scratch_operands = 0 : i64, tpu.core_type = #tpu.core_type<tc>, window_params = [{transform_indices = @transform_0, window_bounds = array<i64: 16, 32>}, {pipeline_mode = #tpu.pipeline_mode<synchronous>, transform_indices = @transform_1, window_bounds = array<i64: 32, 64>}, {pipeline_mode = #tpu.pipeline_mode<synchronous>, transform_indices = @transform_2, window_bounds = array<i64: 1, 64>}, {pipeline_mode = #tpu.pipeline_mode<synchronous>, transform_indices = @transform_3, window_bounds = array<i64: 64, 32>}, {pipeline_mode = #tpu.pipeline_mode<synchronous>, transform_indices = @transform_4, window_bounds = array<i64: 1, 32>}, {pipeline_mode = #tpu.pipeline_mode<synchronous>, transform_indices = @transform_5, window_bounds = array<i64: 1, 32>}, {pipeline_mode = #tpu.pipeline_mode<synchronous>, transform_indices = @transform_6, window_bounds = array<i64: 1, 32>}, {transform_indices = @transform_7, window_bounds = array<i64: 16, 32>}]} {
    %c0 = arith.constant 0 : index
    %c0_0 = arith.constant 0 : index
    %0 = vector.load %arg1[%c0, %c0_0] : memref<16x32xf32, #tpu.memory_space<vmem>>, vector<16x32xf32>
    %1 = arith.truncf %0 : vector<16x32xf32> to vector<16x32xbf16>
    %c0_1 = arith.constant 0 : index
    %c0_2 = arith.constant 0 : index
    %2 = vector.load %arg2[%c0_1, %c0_2] : memref<32x64xbf16, #tpu.memory_space<vmem>>, vector<32x64xbf16>
    %cst = arith.constant dense<0.000000e+00> : vector<16x64xf32>
    %3 = tpu.matmul %1, %2, %cst {dimension_numbers = #tpu.dot_dimension_numbers<[1], [0], [0], [1], [0, 0, 1, 1], [], []>} : vector<16x32xbf16>, vector<32x64xbf16>, vector<16x64xf32> -> vector<16x64xf32>
    %c0_3 = arith.constant 0 : index
    %c0_4 = arith.constant 0 : index
    %4 = vector.load %arg3[%c0_3, %c0_4] : memref<1x64xf32, #tpu.memory_space<vmem>>, vector<1x64xf32>
    %5 = vector.broadcast %4 : vector<1x64xf32> to vector<16x64xf32>
    %6 = arith.addf %3, %5 : vector<16x64xf32>
    %cst_5 = arith.constant 0.000000e+00 : f32
    %7 = vector.broadcast %cst_5 : f32 to vector<16x64xf32>
    %8 = arith.maximumf %6, %7 : vector<16x64xf32>
    %9 = arith.truncf %8 : vector<16x64xf32> to vector<16x64xbf16>
    %c0_6 = arith.constant 0 : index
    %c0_7 = arith.constant 0 : index
    %10 = vector.load %arg4[%c0_6, %c0_7] : memref<64x32xbf16, #tpu.memory_space<vmem>>, vector<64x32xbf16>
    %cst_8 = arith.constant dense<0.000000e+00> : vector<16x32xf32>
    %11 = tpu.matmul %9, %10, %cst_8 {dimension_numbers = #tpu.dot_dimension_numbers<[1], [0], [0], [1], [0, 0, 1, 1], [], []>} : vector<16x64xbf16>, vector<64x32xbf16>, vector<16x32xf32> -> vector<16x32xf32>
    %c0_9 = arith.constant 0 : index
    %c0_10 = arith.constant 0 : index
    %12 = vector.load %arg5[%c0_9, %c0_10] : memref<1x32xf32, #tpu.memory_space<vmem>>, vector<1x32xf32>
    %13 = vector.broadcast %12 : vector<1x32xf32> to vector<16x32xf32>
    %14 = arith.addf %11, %13 : vector<16x32xf32>
    %15 = arith.addf %0, %14 : vector<16x32xf32>
    %cst_11 = arith.constant dense<0.000000e+00> : vector<16xf32>
    %16 = vector.multi_reduction <add>, %15, %cst_11 [1] : vector<16x32xf32> to vector<16xf32>
    %17 = vector.shape_cast %16 : vector<16xf32> to vector<16x1xf32>
    %cst_12 = arith.constant 3.200000e+01 : f32
    %18 = vector.broadcast %cst_12 : f32 to vector<16x1xf32>
    %19 = arith.divf %17, %18 : vector<16x1xf32>
    %20 = vector.broadcast %19 : vector<16x1xf32> to vector<16x32xf32>
    %21 = arith.subf %15, %20 : vector<16x32xf32>
    %22 = arith.mulf %21, %21 : vector<16x32xf32>
    %cst_13 = arith.constant dense<0.000000e+00> : vector<16xf32>
    %23 = vector.multi_reduction <add>, %22, %cst_13 [1] : vector<16x32xf32> to vector<16xf32>
    %24 = vector.shape_cast %23 : vector<16xf32> to vector<16x1xf32>
    %cst_14 = arith.constant 3.200000e+01 : f32
    %25 = vector.broadcast %cst_14 : f32 to vector<16x1xf32>
    %26 = arith.divf %24, %25 : vector<16x1xf32>
    %27 = vector.broadcast %19 : vector<16x1xf32> to vector<16x32xf32>
    %28 = arith.subf %15, %27 : vector<16x32xf32>
    %cst_15 = arith.constant 9.99999974E-6 : f32
    %29 = vector.broadcast %cst_15 : f32 to vector<16x1xf32>
    %30 = arith.addf %26, %29 : vector<16x1xf32>
    %31 = math.rsqrt %30 : vector<16x1xf32>
    %32 = vector.broadcast %31 : vector<16x1xf32> to vector<16x32xf32>
    %33 = arith.mulf %28, %32 : vector<16x32xf32>
    %c0_16 = arith.constant 0 : index
    %c0_17 = arith.constant 0 : index
    %34 = vector.load %arg6[%c0_16, %c0_17] : memref<1x32xf32, #tpu.memory_space<vmem>>, vector<1x32xf32>
    %35 = vector.broadcast %34 : vector<1x32xf32> to vector<16x32xf32>
    %36 = arith.mulf %33, %35 : vector<16x32xf32>
    %c0_18 = arith.constant 0 : index
    %c0_19 = arith.constant 0 : index
    %37 = vector.load %arg7[%c0_18, %c0_19] : memref<1x32xf32, #tpu.memory_space<vmem>>, vector<1x32xf32>
    %38 = vector.broadcast %37 : vector<1x32xf32> to vector<16x32xf32>
    %39 = arith.addf %36, %38 : vector<16x32xf32>
    %c0_20 = arith.constant 0 : index
    %c0_21 = arith.constant 0 : index
    %40 = vector.load %arg8[%c0_20, %c0_21] : memref<16x32xf32, #tpu.memory_space<vmem>>, vector<16x32xf32>
    tpu.vector_store %arg8[%c0_20, %c0_21], %39 {strides = array<i32>} : memref<16x32xf32, #tpu.memory_space<vmem>>, vector<16x32xf32>,
    return
  }
  func.func @transform_0(%arg0: i32) -> (i32, i32) {
    %c0_i32 = arith.constant 0 : i32
    %c0_i32_0 = arith.constant 0 : i32
    return %arg0, %c0_i32 : i32, i32
  }
  func.func @transform_1(%arg0: i32) -> (i32, i32) {
    %c0_i32 = arith.constant 0 : i32
    %c0_i32_0 = arith.constant 0 : i32
    %c0_i32_1 = arith.constant 0 : i32
    return %c0_i32, %c0_i32_0 : i32, i32
  }
  func.func @transform_2(%arg0: i32) -> (i32, i32) {
    %c0_i32 = arith.constant 0 : i32
    %c0_i32_0 = arith.constant 0 : i32
    %c0_i32_1 = arith.constant 0 : i32
    return %c0_i32, %c0_i32_0 : i32, i32
  }
  func.func @transform_3(%arg0: i32) -> (i32, i32) {
    %c0_i32 = arith.constant 0 : i32
    %c0_i32_0 = arith.constant 0 : i32
    %c0_i32_1 = arith.constant 0 : i32
    return %c0_i32, %c0_i32_0 : i32, i32
  }
  func.func @transform_4(%arg0: i32) -> (i32, i32) {
    %c0_i32 = arith.constant 0 : i32
    %c0_i32_0 = arith.constant 0 : i32
    %c0_i32_1 = arith.constant 0 : i32
    return %c0_i32, %c0_i32_0 : i32, i32
  }
  func.func @transform_5(%arg0: i32) -> (i32, i32) {
    %c0_i32 = arith.constant 0 : i32
    %c0_i32_0 = arith.constant 0 : i32
    %c0_i32_1 = arith.constant 0 : i32
    return %c0_i32, %c0_i32_0 : i32, i32
  }
  func.func @transform_6(%arg0: i32) -> (i32, i32) {
    %c0_i32 = arith.constant 0 : i32
    %c0_i32_0 = arith.constant 0 : i32
    %c0_i32_1 = arith.constant 0 : i32
    return %c0_i32, %c0_i32_0 : i32, i32
  }
  func.func @transform_7(%arg0: i32) -> (i32, i32) {
    %c0_i32 = arith.constant 0 : i32
    %c0_i32_0 = arith.constant 0 : i32
    return %arg0, %c0_i32 : i32, i32
  }
}

</mosaic_0001>

<bundles_post_ra>
// kernel: encoder_forward.5
= control target key start
LH: loop header
LB: loop body
LE: loop exit
PB: predicated region body
PF: predicated region fallthrough
CT: control target
= control target key end

     0   :  { %v290_v0 = vmov 0.0   ;;  %vm291_vm0 = vmmov 0   ;;  %vm53_vm1 = vcmask 261120   ;;  %vm140_vm2 = vcmask 523264   ;;  %s381_s1 = inlined_call_operand.vmem [shape: bf16[32,64], index: 1, kind: input, shape index: {}]   ;;  %s382_s0 = inlined_call_operand.vmem [shape: f32[16,32], index: 0, kind: input, shape index: {}]   ;;  %s383_s3 = inlined_call_operand.vmem [shape: bf16[64,32], index: 3, kind: input, shape index: {}]   ;;  %s384_s2 = inlined_call_operand.vmem [shape: f32[1,64], index: 2, kind: input, shape index: {}]   ;;  %s385_s4 = inlined_call_operand.vmem [shape: f32[1,32], index: 4, kind: input, shape index: {}]   ;;  %s386_s5 = inlined_call_operand.vmem [shape: f32[1,32], index: 5, kind: input, shape index: {}]   ;;  %s387_s6 = inlined_call_operand.vmem [shape: f32[1,32], index: 6, kind: input, shape index: {}]   ;;  %s388_s7 = inlined_call_operand.vmem [shape: f32[16,32], index: 7, kind: output, shape index: {}]  }
   0x1   :  { %258 = vmatprep.subr.bf16.mxu0 %v290_v0  ;;  %v280_v1 = vld [vmem:[%s381_s1] sm:$0xff]   ;;  %262 = vmatprep.mubr.msk.bf16.mxu0 %vm291_vm0, %v290_v0  ;;  %v281_v2 = vld [vmem:[%s381_s1 + $0x8] sm:$0xff]   ;;  %v284_v8 = vld [vmem:[%s383_s3 + $0x10] sm:$0xff]  }
   0x2   :  { %266 = vmatprep.subr.bf16.mxu1 %v290_v0  ;;  %274 = vmatprep.mubr.msk.bf16.mxu1 %vm291_vm0, %v290_v0  ;;  %v27_v3 = vld [vmem:[%s382_s0] sm:$0xff]  ;;  %v28_v4 = vld [vmem:[%s382_s0 + $0x8] sm:$0xff]  ;;  %v285_v9 = vld [vmem:[%s383_s3 + $0x18] sm:$0xff]  }
   0x3   :  { %259 = vmatpush3.bf16.msra.mxu0 %v280_v1  ;;  %v282_v5 = vld [vmem:[%s383_s3] sm:$0xff]   ;;  %v283_v6 = vld [vmem:[%s383_s3 + $0x8] sm:$0xff]   ;;  %v29_v7 = vpack.c.bf16 %v28_v4, %v27_v3 }
   0x4   :  { %260 = vmatprep.subr.bf16.mxu0 %v290_v0  ;;  %267 = vmatpush3.bf16.msra.mxu1 %v282_v5  ;;  %v238_v10 = vld [vmem:[%s384_s2] ss:$0 sm:$0xff] }
   0x5   :  { %268 = vmatprep.subr.bf16.mxu1 %v290_v0  ;;  %v242_v20 = vld [vmem:[%s385_s4] ss:$0 sm:$0xff] }
   0x6   :  { %v248_v48 = vld [vmem:[%s386_s5] ss:$0 sm:$0xff] }
   0x7   :  { %261 = vmatpush3.bf16.msra.mxu0 %v281_v2  ;;  %v249_v50 = vld [vmem:[%s387_s6] ss:$0 sm:$0xff] }
   0x8   :  { %269 = vmatpush3.bf16.msra.mxu1 %v283_v6 }
   0x9   :  { %270 = vmatprep.subr.bf16.mxu1 %v290_v0 }
   0xa   :  { %263 = vmatmul.mubr.msk.bf16.vlgmr.msra.gmra.mrb[0].mxu0 %vm53_vm1, %v29_v7 }
   0xc   :  { %271 = vmatpush3.bf16.msra.mxu1 %v284_v8 }
   0xd   :  { %272 = vmatprep.subr.bf16.mxu1 %v290_v0 }
  0x10   :  { %273 = vmatpush3.bf16.msra.mxu1 %v285_v9 }
  0xdd   :  { %v91_v11 = vpop.f32.mrb[0].mxu0 }
  0xde   :  { %v92_v12 = vadd.f32 %v238_v10, %v91_v11  ;;  %v264_v13 = vpop.f32.mrb[1].mxu0 }
  0xdf   :  { %v94_v14 = vpop.f32.mrb[2].mxu0 }
  0xe0   :  { %v95_v15 = vadd.f32 %v238_v10, %v94_v14  ;;  %v265_v16 = vpop.f32.mrb[3].mxu0  ;;  %v98_v17 = vmax.f32 %v92_v12, 0.0 }
  0xe2   :  { %v99_v18 = vmax.f32 %v95_v15, 0.0 }
  0xe4   :  { %v100_v19 = vpack.c.bf16 %v99_v18, %v98_v17 }
  0xe6   :  { %275 = vmatmul.mubr.msk.bf16.vlgmr.msra.gmra.mrb[0].mxu1 %vm140_vm2, %v100_v19 }
 0x1b9   :  { %v178_v21 = vpop.f32.mrb[0].mxu1 }
 0x1ba   :  { %v179_v22 = vadd.f32 %v242_v20, %v178_v21  ;;  %v276_v23 = vpop.f32.mrb[1].mxu1 }
 0x1bb   :  { %v181_v24 = vpop.f32.mrb[2].mxu1 }
 0x1bc   :  { %v182_v25 = vadd.f32 %v242_v20, %v181_v24  ;;  %v277_v26 = vpop.f32.mrb[3].mxu1  ;;  %v185_v27 = vadd.f32 %v179_v22, %v27_v3 }
 0x1be   :  { %v187_v28 = vsel %vm53_vm1, %v185_v27, 0.0  ;;  %v186_v29 = vadd.f32 %v182_v25, %v28_v4 }
 0x1bf   :  { %188 = vadd.xlane.f32.xlu0 %v187_v28 }
 0x1c0   :  { %v190_v30 = vsel %vm53_vm1, %v186_v29, 0.0 }
 0x1c3   :  { %191 = vadd.xlane.f32.xlu0 %v190_v30 }
 0x24c   :  { %v189_v31 = vpop.xlane.xlu0 %188 }
 0x24d   :  { %v194_v32 = vmul.f32 0.03125, %v189_v31 }
 0x24f   :  { %v196_v33 = vsub.f32 %v185_v27, %v194_v32 }
 0x250   :  { %v192_v34 = vpop.xlane.xlu0 %191 }
 0x251   :  { %v195_v35 = vmul.f32 0.03125, %v192_v34  ;;  %v198_v36 = vmul.f32 %v196_v33, %v196_v33 }
 0x253   :  { %v197_v37 = vsub.f32 %v186_v29, %v195_v35  ;;  %v200_v38 = vsel %vm53_vm1, %v198_v36, 0.0 }
 0x254   :  { %201 = vadd.xlane.f32.xlu1 %v200_v38 }
 0x255   :  { %v199_v39 = vmul.f32 %v197_v37, %v197_v37 }
 0x257   :  { %v203_v40 = vsel %vm53_vm1, %v199_v39, 0.0 }
 0x258   :  { %204 = vadd.xlane.f32.xlu1 %v203_v40 }
 0x2e1   :  { %v202_v41 = vpop.xlane.xlu1 %201 }
 0x2e2   :  { %v206_v42 = vmul.f32 0.03125, %v202_v41 }
 0x2e4   :  { %v208_v43 = vadd.f32 1e-05, %v206_v42 }
 0x2e5   :  { %v205_v44 = vpop.xlane.xlu1 %204 }
 0x2e6   :  { %286 = vrsqrt.f32 %v208_v43  ;;  %v207_v45 = vmul.f32 0.03125, %v205_v44 }
 0x2e8   :  { %v209_v46 = vadd.f32 1e-05, %v207_v45 }
 0x2ea   :  { %288 = vrsqrt.f32 %v209_v46 }
 0x2f0   :  { %v287_v47 = vpop.eup %286 }
 0x2f1   :  { %v212_v49 = vmul.f32 %v287_v47, %v196_v33 }
 0x2f3   :  { %v221_v51 = vmul.f32 %v248_v48, %v212_v49 }
 0x2f4   :  { %v289_v52 = vpop.eup %288 }
 0x2f5   :  { %v230_v53 = vadd.f32 %v249_v50, %v221_v51  ;;  %v213_v54 = vmul.f32 %v289_v52, %v197_v37 }
 0x2f7   :  { %232 = vst.msk [vmem:[%s388_s7] sm:$0xff] %vm53_vm1, %v230_v53  ;;  %v222_v55 = vmul.f32 %v248_v48, %v213_v54 }
 0x2f9   :  { %v231_v56 = vadd.f32 %v249_v50, %v222_v55 }
 0x2fb   :  { %233 = vst.msk [vmem:[%s388_s7 + $0x8] sm:$0xff] %vm53_vm1, %v231_v56 }

// kernel: encoder_forward.7
= control target key start
LH: loop header
LB: loop body
LE: loop exit
PB: predicated region body
PF: predicated region fallthrough
CT: control target
= control target key end

     0   :  { %v330_v1 = vmov 0.0   ;;  %vm331_vm0 = vmmov 0   ;;  %vm54_vm1 = vcmask 261120   ;;  %s430_s0 = inlined_call_operand.vmem [shape: f32[16,32], index: 0, kind: input, shape index: {}]   ;;  %s431_s1 = inlined_call_operand.vmem [shape: bf16[32,64], index: 1, kind: input, shape index: {}]   ;;  %s432_s2 = inlined_call_operand.vmem [shape: f32[1,64], index: 2, kind: input, shape index: {}]   ;;  %s433_s3 = inlined_call_operand.vmem [shape: bf16[64,32], index: 3, kind: input, shape index: {}]   ;;  %s434_s4 = inlined_call_operand.vmem [shape: f32[1,32], index: 4, kind: input, shape index: {}]   ;;  %s435_s5 = inlined_call_operand.vmem [shape: f32[1,32], index: 5, kind: input, shape index: {}]   ;;  %s436_s6 = inlined_call_operand.vmem [shape: f32[1,32], index: 6, kind: input, shape index: {}]   ;;  %s437_s7 = inlined_call_operand.hbm [shape: f32[16,32], index: 7, kind: output, shape index: {}]  }
   0x1   :  { %v296_v0 = vld [vmem:[%s431_s1] sm:$0xff]   ;;  %271 = vmatprep.subr.bf16.mxu0 %v330_v1  ;;  %v297_v2 = vld [vmem:[%s431_s1 + $0x8] sm:$0xff]   ;;  %279 = vmatprep.subr.bf16.mxu1 %v330_v1 }
   0x2   :  { %272 = vmatpush3.bf16.msra.mxu0 %v296_v0  ;;  %275 = vmatprep.mubr.msk.bf16.mxu0 %vm331_vm0, %v330_v1  ;;  %v28_v3 = vld [vmem:[%s430_s0] sm:$0xff]  ;;  %v29_v4 = vld [vmem:[%s430_s0 + $0x8] sm:$0xff] }
   0x3   :  { %273 = vmatprep.subr.bf16.mxu0 %v330_v1  ;;  %v298_v5 = vld [vmem:[%s433_s3] sm:$0xff]   ;;  %287 = vmatprep.mubr.msk.bf16.mxu1 %vm331_vm0, %v330_v1  ;;  %v299_v6 = vld [vmem:[%s433_s3 + $0x8] sm:$0xff]   ;;  %v30_v7 = vpack.c.bf16 %v29_v4, %v28_v3 }
   0x4   :  { %280 = vmatpush3.bf16.msra.mxu1 %v298_v5 }
   0x5   :  { %281 = vmatprep.subr.bf16.mxu1 %v330_v1 }
   0x6   :  { %274 = vmatpush3.bf16.msra.mxu0 %v297_v2 }
   0x7   :  { %12 = vsyncpa [#allocation3], 0  ;;  %v300_v8 = vld [vmem:[%s433_s3 + $0x10] sm:$0xff]   ;;  %v301_v9 = vld [vmem:[%s433_s3 + $0x18] sm:$0xff]   ;;  %vm141_vm2 = vcmask 523264   ;;  %s332_s20 = smov [#allocation2]  }
   0x8   :  { %282 = vmatpush3.bf16.msra.mxu1 %v299_v6  ;;  %v251_v10 = vld [vmem:[%s432_s2] ss:$0 sm:$0xff]  ;;  %s240_s21 = sshll.u32 %s332_s20, 4  ;;  %s241_s21 = int_to_ptr.vmem [resolvable:$true] %s240_s21 }
   0x9   :  { %276 = vmatmul.mubr.msk.bf16.vlgmr.msra.gmra.mrb[0].mxu0 %vm54_vm1, %v30_v7  ;;  %283 = vmatprep.subr.bf16.mxu1 %v330_v1  ;;  %v255_v20 = vld [vmem:[%s434_s4] ss:$0 sm:$0xff]  ;;  %s306_s22 = scalar_lea.vmem %s241_s21, 256  ;;  %p311_p1 = scmp.lt.s32.totalorder %s241_s21, %s241_s21 }
   0xa   :  { %v261_v48 = vld [vmem:[%s435_s5] ss:$0 sm:$0xff]  ;;  %p307_p0 = scmp.ne.s32.totalorder %s241_s21, %s306_s22  ;;  %p312_p2 = scmp.lt.s32.totalorder %s306_s22, %s306_s22 }
   0xb   :  { %v262_v50 = vld [vmem:[%s436_s6] ss:$0 sm:$0xff] }
   0xc   :  { %284 = vmatpush3.bf16.msra.mxu1 %v300_v8  ;;  %p313_p3 = por %p312_p2, %p311_p1 }
   0xd   :  { %285 = vmatprep.subr.bf16.mxu1 %v330_v1 }
   0xe   :  { %p314_p4 = pnand %p313_p3, %p307_p0 }
  0x10   :  { %286 = vmatpush3.bf16.msra.mxu1 %v301_v9 }
  0xdc   :  { %v92_v11 = vpop.f32.mrb[0].mxu0 }
  0xdd   :  { %v93_v12 = vadd.f32 %v251_v10, %v92_v11  ;;  %v277_v13 = vpop.f32.mrb[1].mxu0 }
  0xde   :  { %v95_v14 = vpop.f32.mrb[2].mxu0 }
  0xdf   :  { %v96_v15 = vadd.f32 %v251_v10, %v95_v14  ;;  %v278_v16 = vpop.f32.mrb[3].mxu0  ;;  %v99_v17 = vmax.f32 %v93_v12, 0.0 }
  0xe1   :  { %v100_v18 = vmax.f32 %v96_v15, 0.0 }
  0xe3   :  { %v101_v19 = vpack.c.bf16 %v100_v18, %v99_v17 }
  0xe5   :  { %288 = vmatmul.mubr.msk.bf16.vlgmr.msra.gmra.mrb[0].mxu1 %vm141_vm2, %v101_v19 }
 0x1b8   :  { %v179_v21 = vpop.f32.mrb[0].mxu1 }
 0x1b9   :  { %v180_v22 = vadd.f32 %v255_v20, %v179_v21  ;;  %v289_v23 = vpop.f32.mrb[1].mxu1 }
 0x1ba   :  { %v182_v24 = vpop.f32.mrb[2].mxu1 }
 0x1bb   :  { %v183_v25 = vadd.f32 %v255_v20, %v182_v24  ;;  %v290_v26 = vpop.f32.mrb[3].mxu1  ;;  %v186_v27 = vadd.f32 %v180_v22, %v28_v3 }
 0x1bd   :  { %v188_v28 = vsel %vm54_vm1, %v186_v27, 0.0  ;;  %v187_v29 = vadd.f32 %v183_v25, %v29_v4 }
 0x1be   :  { %189 = vadd.xlane.f32.xlu0 %v188_v28 }
 0x1bf   :  { %v191_v30 = vsel %vm54_vm1, %v187_v29, 0.0 }
 0x1c2   :  { %192 = vadd.xlane.f32.xlu0 %v191_v30 }
 0x24b   :  { %v190_v31 = vpop.xlane.xlu0 %189 }
 0x24c   :  { %v195_v32 = vmul.f32 0.03125, %v190_v31 }
 0x24e   :  { %v197_v33 = vsub.f32 %v186_v27, %v195_v32 }
 0x24f   :  { %v193_v34 = vpop.xlane.xlu0 %192 }
 0x250   :  { %v196_v35 = vmul.f32 0.03125, %v193_v34  ;;  %v199_v36 = vmul.f32 %v197_v33, %v197_v33 }
 0x252   :  { %v198_v37 = vsub.f32 %v187_v29, %v196_v35  ;;  %v201_v38 = vsel %vm54_vm1, %v199_v36, 0.0 }
 0x253   :  { %202 = vadd.xlane.f32.xlu1 %v201_v38 }
 0x254   :  { %v200_v39 = vmul.f32 %v198_v37, %v198_v37 }
 0x256   :  { %v204_v40 = vsel %vm54_vm1, %v200_v39, 0.0 }
 0x257   :  { %205 = vadd.xlane.f32.xlu1 %v204_v40 }
 0x2e0   :  { %v203_v41 = vpop.xlane.xlu1 %202 }
 0x2e1   :  { %v207_v42 = vmul.f32 0.03125, %v203_v41 }
 0x2e3   :  { %v209_v43 = vadd.f32 1e-05, %v207_v42 }
 0x2e4   :  { %v206_v44 = vpop.xlane.xlu1 %205 }
 0x2e5   :  { %302 = vrsqrt.f32 %v209_v43  ;;  %v208_v45 = vmul.f32 0.03125, %v206_v44 }
 0x2e7   :  { %v210_v46 = vadd.f32 1e-05, %v208_v45 }
 0x2e9   :  { %304 = vrsqrt.f32 %v210_v46 }
 0x2ef   :  { %v303_v47 = vpop.eup %302 }
 0x2f0   :  { %v213_v49 = vmul.f32 %v303_v47, %v197_v33 }
 0x2f2   :  { %v222_v51 = vmul.f32 %v261_v48, %v213_v49 }
 0x2f3   :  { %v305_v52 = vpop.eup %304 }
 0x2f4   :  { %v214_v53 = vmul.f32 %v305_v52, %v198_v37  ;;  %v231_v54 = vadd.f32 %v262_v50, %v222_v51 }
 0x2f6   :  { %v223_v55 = vmul.f32 %v261_v48, %v214_v53  ;;  %233 = vst.msk [vmem:[#allocation2] sm:$0xff] %vm54_vm1, %v231_v54 }
 0x2f8   :  { %v232_v56 = vadd.f32 %v262_v50, %v223_v55 }
 0x2fa   :  { %234 = vst.msk [vmem:[#allocation2 + $0x8] sm:$0xff] %vm54_vm1, %v232_v56 }
 0x2fb   :  { %317 = shalt.err (!%p314_p4)
}
 0x2fc   :  { %s318_s23 = scalar_lea.hbm %s437_s7, 256 }
 0x2fd   :  { %p319_p5 = scmp.ne.s32.totalorder %s437_s7, %s318_s23  ;;  %p322_p6 = scmp.lt.u32.totalorder %s318_s23, %s437_s7 }
 0x2ff   :  { %p324_p7 = pnand %p322_p6, %p319_p5 }
 0x301   :  { %327 = shalt.err (!%p324_p7)
}
 0x302   :  { %s333_s28 = smov 128   ;;  %s334_s29 = smov 8  }
 0x303   :  { %246 = dma.vmem_to_hbm [thread:$0]  %s241_s21, 256, %s437_s7, [#allocation3], %s333_s28, %s333_s28, %s334_s29  }
 0x304   :  { %328 = dma.done.wait [#allocation3], 256  }
 0x305   :  { %329 = vsyncadd [#allocation3], 4294967040 }
 0x306   :  { %250 = vsyncpa [#allocation3], 1 }

// kernel: encoder_forward.4
= control target key start
LH: loop header
LB: loop body
LE: loop exit
PB: predicated region body
PF: predicated region fallthrough
CT: control target
= control target key end

     0   :  { %s1251_s27 = smov 0   ;;  %s1388_s0 = inlined_call_operand.vmem [shape: f32[2,8,32], index: 0, kind: input, shape index: {}]   ;;  %s1389_s1 = inlined_call_operand.vmem [shape: bf16[32,96], index: 1, kind: input, shape index: {}]   ;;  %s1390_s2 = inlined_call_operand.vmem [shape: f32[1,96], index: 2, kind: input, shape index: {}]   ;;  %s1391_s3 = inlined_call_operand.vmem [shape: bf16[32,32], index: 3, kind: input, shape index: {}]   ;;  %s1392_s4 = inlined_call_operand.vmem [shape: f32[1,32], index: 4, kind: input, shape index: {}]   ;;  %s1393_s5 = inlined_call_operand.vmem [shape: f32[2,1,8], index: 5, kind: input, shape index: {}]   ;;  %s1394_s6 = inlined_call_operand.vmem [shape: f32[1,32], index: 6, kind: input, shape index: {}]   ;;  %s1395_s7 = inlined_call_operand.vmem [shape: f32[1,32], index: 7, kind: input, shape index: {}]   ;;  %s1396_s8 = inlined_call_operand.vmem [shape: f32[2,8,32], index: 8, kind: output, shape index: {}]  }
   0x1 LB: > { %s1021_s28 = sadd.s32 4294967295, %s1187_s27   ;;  %p1025_p0 = scmp.ge.s32.totalorder %s1187_s27, 1  ;;  %s1187_s27 = sphi %s1251_s27, %s18_s27  }
   0x2   : > { %p269_p1 = scmp.lt.s32.totalorder %s1187_s27, 3 }
   0x4   : > { %p270_p2 = pnand %p1025_p0, %p269_p1 }
   0x5   : > { %v1159_v0 = vld [vmem:[%s1389_s1] sm:$0xff] (!%p270_p2)   ;;  %v1189_v1 = vmov (!%p270_p2), 0.0   ;;  %v1160_v2 = vld [vmem:[%s1389_s1 + $0x8] sm:$0xff] (!%p270_p2)   ;;  %vm1190_vm0 = vmmov (!%p270_p2), 0   ;;  %p304_p3 = scmp.lt.s32.totalorder (!%p270_p2), %s1021_s28, 1  ;;  %vm341_vm1 = vcmask (!%p270_p2), 261120   ;;  %v440_v23 = vlaneseq (!%p270_p2) }
   0x6   : > { %273 = sbr.rel (%p270_p2) target bundleno = 1811 (0x713), region = 52  ;;  %1070 = vmatprep.subr.bf16.mxu0 (!%p270_p2), %v1189_v1  ;;  %1078 = vmatprep.subr.bf16.mxu1 (!%p270_p2), %v1189_v1  ;;  %v1028_v5 = vld [vmem:[%s1390_s2] ss:$0 sm:$0xff] (!%p270_p2)  ;;  %s1191_s17 = smov (!%p270_p2), 120   ;;  %vm390_vm2 = vcmask (!%p270_p2), 64512   ;;  %v1198_v27 = vmov (!%p270_p2), 0  }
   0x7   : > { %1071 = vmatpush3.bf16.msra.mxu0 (!%p270_p2), %v1159_v0  ;;  %1074 = vmatprep.mubr.msk.bf16.mxu0 (!%p270_p2), %vm1190_vm0, %v1189_v1  ;;  %s1192_s18 = smov (!%p270_p2), 96   ;;  %s1193_s19 = smov (!%p270_p2), 80   ;;  %v441_v25 = vshrl.u32 (!%p270_p2), %v440_v23, 7  ;;  %vm463_vm5 = vcmask (!%p270_p2), 1043456   ;;  %vm856_vm6 = vcmask (!%p270_p2), 130048   ;;  %vm858_vm7 = vcmask (!%p270_p2), 195584  }
   0x8   : > { %1072 = vmatprep.subr.bf16.mxu0 (!%p270_p2), %v1189_v1  ;;  %1080 = vmatprep.mubr.msk.bf16.mxu1 (!%p270_p2), %vm1190_vm0, %v1189_v1  ;;  %s1194_s20 = smov (!%p270_p2), 88   ;;  %s1195_s21 = smov (!%p270_p2), 72  }
   0x9   : > { %s1196_s22 = smov (!%p270_p2), 112   ;;  %s1197_s23 = smov (!%p270_p2), 104   ;;  %v442_v26 = vsub.s32 (!%p270_p2), 0, %v441_v25 }
   0xa   : > { %s1199_s29 = smov (!%p270_p2), 56   ;;  %s1200_s30 = smov (!%p270_p2), 64  }
   0xb   : > { %1073 = vmatpush3.bf16.msra.mxu0 (!%p270_p2), %v1160_v2  ;;  %s1201_s9 = smov (!%p270_p2), 40   ;;  %s1202_s10 = smov (!%p270_p2), 48  }
   0xc   : > { %1084 = vmatprep.subr.bf16.mxu0 (!%p270_p2), %v1189_v1  ;;  %s1203_s12 = smov (!%p270_p2), 8  }
   0xd   : > { %s1398_s28 = smov (!%p304_p3, %s1021_s28), 1 }
   0xe   : > { %s1026_s11 = sshll.u32 %s1398_s28, 3  ;;  %s310_s26 = scalar_lea.vmem %s1393_s5, %s1398_s28 }
   0xf   : > { %s307_s14 = scalar_lea.vmem %s1388_s0, %s1026_s11  ;;  %v385_v24 = vld [vmem:[%s310_s26] sm:$0x1] }
  0x10   : > { %v1281_v3 = vld [vmem:[%s307_s14] sm:$0xff]  ;;  %vm438_vm3 = vcmp.gt.f32.partialorder %v385_v24, 0.0 }
  0x11   : > { %v317_v4 = vpack.c.bf16 %v1281_v3, %v1281_v3  ;;  %v439_v28 = vsel %vm438_vm3, 1, %v1198_v27 }
  0x12   : > { %v443_v29 = vrot.slane %v439_v28, %v442_v26 }
  0x13   : > { %1075 = vmatmul.mubr.msk.bf16.vlgmr.msra.gmra.mrb[0].mxu0 %vm341_vm1, %v317_v4 }
  0x14   : > { %1086 = vmatprep.mubr.msk.bf16.mxu0 %vm1190_vm0, %v1189_v1  ;;  %vm444_vm4 = vcmp.eq.s32.totalorder %v443_v29, 1 }
  0xe6   : > { %v379_v6 = vpop.f32.mrb[0].mxu0 }
  0xe7   : > { %v380_v7 = vadd.f32 %v1028_v5, %v379_v6  ;;  %v1076_v8 = vpop.f32.mrb[1].mxu0 }
  0xe8   : > { %v382_v9 = vpop.f32.mrb[2].mxu0 }
  0xe9   : > { %v1291_v10 = vpack.c.bf16 %v380_v7, %v380_v7  ;;  %v1077_v11 = vpop.f32.mrb[3].mxu0 }
  0xeb   : > { %507 = vrot.lane.b32.xlu1 %v1291_v10, %s1191_s17  ;;  %388 = vrot.lane.b32.xlu0 %v1291_v10, %s1192_s18  ;;  %s1204_s17 = smov 16   ;;  %s1205_s18 = smov 24  }
  0xef   : > { %621 = vrot.lane.b32.xlu1 %v1291_v10, %s1193_s19  ;;  %509 = vrot.lane.b32.xlu0 %v1291_v10, %s1194_s20 }
  0xf3   : > { %733 = vrot.lane.b32.xlu1 %v1291_v10, %s1195_s21  ;;  %619 = vrot.lane.b32.xlu0 %v1291_v10, %s1196_s22 }
  0xf7   : > { %731 = vrot.lane.b32.xlu0 %v1291_v10, %s1197_s23 }
 0x15d   : > { %v389_v12 = vpop.permute.xlu0 %388  ;;  %v508_v15 = vpop.permute.xlu1 %507 }
 0x15e   : > { %v395_v13 = vsel %vm390_vm2, %v389_v12, 0 }
 0x15f   : > { %1079 = vmatpush3.bf16.xpose.msra.mxu1 %v395_v13 }
 0x160   : > { %1090 = vmatprep.subr.bf16.mxu1 %v1189_v1 }
 0x161   : > { %v510_v14 = vpop.permute.xlu0 %509  ;;  %v622_v17 = vpop.permute.xlu1 %621 }
 0x162   : > { %v515_v16 = vsel %vm390_vm2, %v510_v14, 0  ;;  %v627_v18 = vsel %vm390_vm2, %v622_v17, 0 }
 0x165   : > { %v734_v19 = vpop.permute.xlu1 %733  ;;  %v620_v20 = vpop.permute.xlu0 %619 }
 0x166   : > { %1081 = vmatmul.mubr.msk.bf16.vlgmr.msra.gmra.mrb[0].mxu1 %vm390_vm2, %v1291_v10  ;;  %v739_v21 = vsel %vm390_vm2, %v734_v19, 0 }
 0x167   : > { %1091 = vmatpush3.bf16.xpose.msra.mxu1 %v515_v16  ;;  %1092 = vmatprep.mubr.msk.bf16.mxu1 %vm1190_vm0, %v1189_v1 }
 0x168   : > { %1102 = vmatprep.subr.bf16.mxu1 %v1189_v1 }
 0x169   : > { %v732_v22 = vpop.permute.xlu0 %731 }
 0x16e   : > { %1093 = vmatmul.mubr.msk.bf16.vlgmr.msra.gmra.mrb[4].mxu1 %vm390_vm2, %v508_v15 }
 0x16f   : > { %1103 = vmatpush3.bf16.xpose.msra.mxu1 %v627_v18  ;;  %1104 = vmatprep.mubr.msk.bf16.mxu1 %vm1190_vm0, %v1189_v1 }
 0x170   : > { %1114 = vmatprep.subr.bf16.mxu1 %v1189_v1 }
 0x176   : > { %1105 = vmatmul.mubr.msk.bf16.vlgmr.msra.gmra.mrb[8].mxu1 %vm390_vm2, %v620_v20 }
 0x177   : > { %1115 = vmatpush3.bf16.xpose.msra.mxu1 %v739_v21  ;;  %1116 = vmatprep.mubr.msk.bf16.mxu1 %vm1190_vm0, %v1189_v1 }
 0x178   : > { %1126 = vmatprep.subr.bf16.mxu1 %v1189_v1 }
 0x17e   : > { %1117 = vmatmul.mubr.msk.bf16.vlgmr.msra.gmra.mrb[12].mxu1 %vm390_vm2, %v732_v22 }
 0x17f   : > { %1130 = vmatprep.mubr.msk.bf16.mxu1 %vm1190_vm0, %v1189_v1 }
 0x239   : > { %v431_v30 = vpop.f32.mrb[0].mxu1 }
 0x23a   : > { %v437_v31 = vmul.f32 0.35355338, %v431_v30  ;;  %v1082_v32 = vpop.f32.mrb[1].mxu1 }
 0x23b   : > { %v434_v33 = vpop.f32.mrb[2].mxu1 }
 0x23c   : > { %v1083_v34 = vpop.f32.mrb[3].mxu1  ;;  %v445_v35 = vsel %vm444_vm4, %v437_v31, -1e+10 }
 0x23d   : > { %v446_v36 = vsel %vm390_vm2, %v445_v35, -inf }
 0x23e   : > { %447 = vmax.xlane.f32.xlu1 %v446_v36 }
 0x241   : > { %v551_v37 = vpop.f32.mrb[4].mxu1 }
 0x242   : > { %v557_v38 = vmul.f32 0.35355338, %v551_v37  ;;  %v1094_v39 = vpop.f32.mrb[5].mxu1 }
 0x243   : > { %v554_v40 = vpop.f32.mrb[6].mxu1 }
 0x244   : > { %v1095_v41 = vpop.f32.mrb[7].mxu1  ;;  %v558_v42 = vsel %vm444_vm4, %v557_v38, -1e+10 }
 0x245   : > { %v559_v43 = vsel %vm390_vm2, %v558_v42, -inf }
 0x246   : > { %560 = vmax.xlane.f32.xlu0 %v559_v43 }
 0x249   : > { %v663_v44 = vpop.f32.mrb[8].mxu1 }
 0x24a   : > { %v669_v45 = vmul.f32 0.35355338, %v663_v44  ;;  %v1106_v46 = vpop.f32.mrb[9].mxu1 }
 0x24b   : > { %v666_v47 = vpop.f32.mrb[10].mxu1 }
 0x24c   : > { %v1107_v48 = vpop.f32.mrb[11].mxu1  ;;  %v670_v49 = vsel %vm444_vm4, %v669_v45, -1e+10 }
 0x24d   : > { %v671_v50 = vsel %vm390_vm2, %v670_v49, -inf  ;;  %v1161_v48 = vld [vmem:[%s1391_s3] sm:$0xff]  }
 0x24e   : > { %672 = vmax.xlane.f32.xlu0 %v671_v50  ;;  %1127 = vmatpush3.bf16.msra.mxu1 %v1161_v48 }
 0x24f   : > { %1128 = vmatprep.subr.bf16.mxu1 %v1189_v1 }
 0x251   : > { %v775_v51 = vpop.f32.mrb[12].mxu1 }
 0x252   : > { %v781_v52 = vmul.f32 0.35355338, %v775_v51  ;;  %v1118_v53 = vpop.f32.mrb[13].mxu1 }
 0x253   : > { %v778_v54 = vpop.f32.mrb[14].mxu1 }
 0x254   : > { %v1119_v55 = vpop.f32.mrb[15].mxu1  ;;  %v782_v56 = vsel %vm444_vm4, %v781_v52, -1e+10 }
 0x255   : > { %v783_v57 = vsel %vm390_vm2, %v782_v56, -inf }
 0x256   : > { %784 = vmax.xlane.f32.xlu1 %v783_v57 }
 0x2cb   : > { %v448_v58 = vpop.xlane.xlu1 %447 }
 0x2cc   : > { %v449_v59 = vsub.f32 %v445_v35, %v448_v58 }
 0x2ce   : > { %v450_v60 = vmul.f32 1.442695, %v449_v59 }
 0x2d0   : > { %1163 = vpow2.f32 %v450_v60 }
 0x2d3   : > { %v561_v61 = vpop.xlane.xlu0 %560 }
 0x2d4   : > { %v562_v62 = vsub.f32 %v558_v42, %v561_v61 }
 0x2d6   : > { %v563_v63 = vmul.f32 1.442695, %v562_v62 }
 0x2d8   : > { %1165 = vpow2.f32 %v563_v63 }
 0x2da   : > { %v1164_v0 = vpop.eup %1163 }
 0x2db   : > { %v673_v2 = vpop.xlane.xlu0 %672  ;;  %v452_v4 = vsel %vm390_vm2, %v1164_v0, 0.0 }
 0x2dc   : > { %v674_v5 = vsub.f32 %v670_v49, %v673_v2  ;;  %453 = vadd.xlane.f32.xlu0 %v452_v4  ;;  %v1162_v49 = vld [vmem:[%s1391_s3 + $0x8] sm:$0xff]  }
 0x2dd   : > { %1129 = vmatpush3.bf16.msra.mxu1 %v1162_v49 }
 0x2de   : > { %v675_v6 = vmul.f32 1.442695, %v674_v5 }
 0x2e0   : > { %1167 = vpow2.f32 %v675_v6 }
 0x2e2   : > { %v1166_v7 = vpop.eup %1165 }
 0x2e3   : > { %v565_v8 = vsel %vm390_vm2, %v1166_v7, 0.0  ;;  %v785_v12 = vpop.xlane.xlu1 %784 }
 0x2e4   : > { %566 = vadd.xlane.f32.xlu1 %v565_v8  ;;  %v786_v13 = vsub.f32 %v782_v56, %v785_v12 }
 0x2e6   : > { %v787_v14 = vmul.f32 1.442695, %v786_v13 }
 0x2e8   : > { %1169 = vpow2.f32 %v787_v14 }
 0x2ea   : > { %v1168_v9 = vpop.eup %1167 }
 0x2eb   : > { %v677_v11 = vsel %vm390_vm2, %v1168_v9, 0.0 }
 0x2ec   : > { %678 = vadd.xlane.f32.xlu0 %v677_v11 }
 0x2f2   : > { %v1170_v15 = vpop.eup %1169 }
 0x2f3   : > { %v789_v16 = vsel %vm390_vm2, %v1170_v15, 0.0 }
 0x2f5   : > { %571 = vrot.lane.b32.xlu1 %v1291_v10, %s1199_s29  ;;  %s314_s29 = scalar_lea.vmem %s1396_s8, %s1026_s11 }
 0x302   : > { %458 = vrot.lane.b32.xlu0 %v1291_v10, %s1200_s30 }
 0x306   : > { %795 = vrot.lane.b32.xlu0 %v1291_v10, %s1201_s9 }
 0x319   : > { %790 = vadd.xlane.f32.xlu1 %v789_v16 }
 0x32a   : > { %683 = vrot.lane.b32.xlu1 %v1291_v10, %s1202_s10 }
 0x369   : > { %v454_v17 = vpop.xlane.xlu0 %453 }
 0x36a   : > { %1171 = vrcp.f32 %v454_v17 }
 0x371   : > { %v567_v18 = vpop.xlane.xlu1 %566 }
 0x372   : > { %1173 = vrcp.f32 %v567_v18 }
 0x374   : > { %v1172_v19 = vpop.eup %1171 }
 0x375   : > { %v456_v21 = vmul.f32 %v1172_v19, %v1164_v0  ;;  %v572_v24 = vpop.permute.xlu1 %571  ;;  %v1040_v0 = vld [vmem:[%s1392_s4] ss:$0 sm:$0xff] }
 0x376   : > { %v577_v27 = vsel %vm463_vm5, %v572_v24, 0 }
 0x377   : > { %v457_v25 = vpack.c.bf16 %v456_v21, %v456_v21  ;;  %v1045_v21 = vld [vmem:[%s1395_s7] ss:$0 sm:$0xff] }
 0x379   : > { %v679_v20 = vpop.xlane.xlu0 %678 }
 0x37a   : > { %1175 = vrcp.f32 %v679_v20 }
 0x37c   : > { %v1174_v26 = vpop.eup %1173 }
 0x37d   : > { %v459_v22 = vpop.permute.xlu0 %458  ;;  %v569_v10 = vmul.f32 %v1174_v26, %v1166_v7 }
 0x37e   : > { %v465_v23 = vsel %vm463_vm5, %v459_v22, 0 }
 0x37f   : > { %1085 = vmatpush3.bf16.msra.mxu0 %v465_v23  ;;  %v570_v28 = vpack.c.bf16 %v569_v10, %v569_v10 }
 0x380   : > { %1096 = vmatprep.subr.bf16.mxu0 %v1189_v1 }
 0x381   : > { %v796_v34 = vpop.permute.xlu0 %795 }
 0x382   : > { %1087 = vmatmul.mubr.msk.bf16.vlgmr.msra.gmra.mrb[4].mxu0 %vm390_vm2, %v457_v25  ;;  %v801_v36 = vsel %vm463_vm5, %v796_v34, 0 }
 0x383   : > { %1097 = vmatpush3.bf16.msra.mxu0 %v577_v27  ;;  %1098 = vmatprep.mubr.msk.bf16.mxu0 %vm1190_vm0, %v1189_v1 }
 0x384   : > { %1108 = vmatprep.subr.bf16.mxu0 %v1189_v1  ;;  %v1176_v29 = vpop.eup %1175 }
 0x385   : > { %v681_v31 = vmul.f32 %v1176_v29, %v1168_v9 }
 0x387   : > { %v682_v35 = vpack.c.bf16 %v681_v31, %v681_v31 }
 0x38a   : > { %1099 = vmatmul.mubr.msk.bf16.vlgmr.msra.gmra.mrb[8].mxu0 %vm390_vm2, %v570_v28 }
 0x38b   : > { %1110 = vmatprep.mubr.msk.bf16.mxu0 %vm1190_vm0, %v1189_v1 }
 0x3a6   : > { %v791_v30 = vpop.xlane.xlu1 %790 }
 0x3a7   : > { %1177 = vrcp.f32 %v791_v30 }
 0x3aa   : > { %v684_v32 = vpop.permute.xlu1 %683 }
 0x3ab   : > { %v689_v33 = vsel %vm463_vm5, %v684_v32, 0 }
 0x3ac   : > { %1109 = vmatpush3.bf16.msra.mxu0 %v689_v33 }
 0x3ad   : > { %1120 = vmatprep.subr.bf16.mxu0 %v1189_v1 }
 0x3af   : > { %1111 = vmatmul.mubr.msk.bf16.vlgmr.msra.gmra.mrb[12].mxu0 %vm390_vm2, %v682_v35 }
 0x3b0   : > { %1121 = vmatpush3.bf16.msra.mxu0 %v801_v36  ;;  %1122 = vmatprep.mubr.msk.bf16.mxu0 %vm1190_vm0, %v1189_v1 }
 0x3b1   : > { %v1178_v37 = vpop.eup %1177 }
 0x3b2   : > { %v793_v38 = vmul.f32 %v1178_v37, %v1170_v15 }
 0x3b4   : > { %v794_v39 = vpack.c.bf16 %v793_v38, %v793_v38 }
 0x3b7   : > { %1123 = vmatmul.mubr.msk.bf16.vlgmr.msra.gmra.mrb[16].mxu0 %vm390_vm2, %v794_v39 }
 0x455   : > { %v501_v40 = vpop.f32.mrb[4].mxu0 }
 0x456   : > { %v1088_v41 = vpop.f32.mrb[5].mxu0 }
 0x457   : > { %v504_v42 = vpop.f32.mrb[6].mxu0 }
 0x458   : > { %v1089_v43 = vpop.f32.mrb[7].mxu0 }
 0x45d   : > { %v613_v44 = vpop.f32.mrb[8].mxu0 }
 0x45e   : > { %844 = vrot.lane.b32.xlu1 %v613_v44, %s1203_s12  ;;  %v1100_v45 = vpop.f32.mrb[9].mxu0 }
 0x45f   : > { %v616_v46 = vpop.f32.mrb[10].mxu0 }
 0x460   : > { %v1101_v47 = vpop.f32.mrb[11].mxu0 }
 0x482   : > { %v725_v50 = vpop.f32.mrb[12].mxu0 }
 0x483   : > { %848 = vrot.lane.b32.xlu0 %v725_v50, %s1204_s17  ;;  %v1112_v51 = vpop.f32.mrb[13].mxu0 }
 0x484   : > { %v728_v52 = vpop.f32.mrb[14].mxu0 }
 0x485   : > { %v1113_v53 = vpop.f32.mrb[15].mxu0 }
 0x48a   : > { %v837_v54 = vpop.f32.mrb[16].mxu0 }
 0x48b   : > { %852 = vrot.lane.b32.xlu1 %v837_v54, %s1205_s18  ;;  %v1124_v55 = vpop.f32.mrb[17].mxu0 }
 0x48c   : > { %v840_v56 = vpop.f32.mrb[18].mxu0 }
 0x48d   : > { %v1125_v57 = vpop.f32.mrb[19].mxu0 }
 0x4d0   : > { %v845_v58 = vpop.permute.xlu1 %844 }
 0x4d1   : > { %v855_v59 = vsel %vm390_vm2, %v501_v40, %v845_v58 }
 0x4f5   : > { %v849_v1 = vpop.permute.xlu0 %848 }
 0x4f6   : > { %v857_v60 = vsel %vm856_vm6, %v855_v59, %v849_v1 }
 0x4fd   : > { %v853_v61 = vpop.permute.xlu1 %852 }
 0x4fe   : > { %v859_v62 = vsel %vm858_vm7, %v857_v60, %v853_v61 }
 0x4ff   : > { %v860_v63 = vpack.c.bf16 %v859_v62, %v859_v62 }
 0x501   : > { %1131 = vmatmul.mubr.msk.bf16.vlgmr.msra.gmra.mrb[16].mxu1 %vm341_vm1, %v860_v63 }
 0x5d4   : > { %v921_v2 = vpop.f32.mrb[16].mxu1 }
 0x5d5   : > { %v922_v4 = vadd.f32 %v1040_v0, %v921_v2  ;;  %v1132_v5 = vpop.f32.mrb[17].mxu1 }
 0x5d6   : > { %v924_v6 = vpop.f32.mrb[18].mxu1 }
 0x5d7   : > { %v1133_v7 = vpop.f32.mrb[19].mxu1  ;;  %v927_v8 = vadd.f32 %v922_v4, %v1281_v3  ;;  %v1044_v3 = vld [vmem:[%s1394_s6] ss:$0 sm:$0xff] }
 0x5d9   : > { %v928_v9 = vsel %vm341_vm1, %v927_v8, 0.0 }
 0x5da   : > { %929 = vadd.xlane.f32.xlu0 %v928_v9 }
 0x667   : > { %v930_v11 = vpop.xlane.xlu0 %929 }
 0x668   : > { %v932_v12 = vmul.f32 0.03125, %v930_v11 }
 0x66a   : > { %v933_v13 = vsub.f32 %v927_v8, %v932_v12 }
 0x66c   : > { %v934_v14 = vmul.f32 %v933_v13, %v933_v13 }
 0x66e   : > { %v935_v15 = vsel %vm341_vm1, %v934_v14, 0.0 }
 0x66f   : > { %936 = vadd.xlane.f32.xlu1 %v935_v15 }
 0x6fc   : > { %v937_v16 = vpop.xlane.xlu1 %936 }
 0x6fd   : > { %v938_v17 = vmul.f32 0.03125, %v937_v16 }
 0x6ff   : > { %v939_v18 = vadd.f32 1e-05, %v938_v17 }
 0x701   : > { %1179 = vrsqrt.f32 %v939_v18 }
 0x70b   : > { %v1180_v19 = vpop.eup %1179 }
 0x70c   : > { %v941_v20 = vmul.f32 %v1180_v19, %v933_v13 }
 0x70e   : > { %v949_v22 = vmul.f32 %v1044_v3, %v941_v20 }
 0x710   : > { %v957_v23 = vadd.f32 %v1045_v21, %v949_v22 }
 0x712   : > { %958 = vst.msk [vmem:[%s314_s29] sm:$0xff] %vm341_vm1, %v957_v23 }
 0x713 PF: > { %s18_s27 = sadd.s32 1, %s1187_s27  }
 0x714   : > { %p15_p4 = scmp.ge.s32.totalorder %s18_s27, 4  }
 0x716   :  { %17 = sbr.rel (!%p15_p4) target bundleno = 1 (0x1), region = 85 }

</bundles_post_ra>
